<compile_context>
chip_gen: v5e
topology: v5e:2x2
jax: 0.10.0
libtpu: 0.0.40
codegen_flags: <defaults>
</compile_context>

<pallas_src>
import functools

import jax
import jax.numpy as jnp
import numpy as np
from jax import lax
from jax.experimental import pallas as pl
from jax.experimental.pallas import tpu as pltpu


def _round_up(x, m):
    return (x + m - 1) // m * m


def _cdiv(a, b):
    return (a + b - 1) // b


# ----------------------------- fused kernel -----------------------------------------

def aligner_kernel(text_ref, feats_ref, mask_ref,
                   tw1_ref, tb1_ref, tw2_ref, tb2_ref,
                   fw1_ref, fb1_ref, fw2_ref, fb2_ref, fw3_ref, fb3_ref,
                   out_ref, *, t_feats):
    bblk, ttp, adim = text_ref.shape      # (batch block, padded T_text, adim)
    _, tfp, odim = feats_ref.shape        # (batch block, padded T_feats, odim)

    def conv3(x3, wf_ref, b_ref):
        # k=3 "same" conv as ONE MXU matmul:
        #   xcat = [x[t-1] | x[t] | x[t+1]]  (K = 3*Cin), weight shipped as (3*Cin, Cout).
        # Shifts are per-sample zero-row concats (exact conv zero padding, no wraparound).
        b, tp, cin = x3.shape
        xb = x3.astype(jnp.bfloat16)
        zrow = jnp.zeros((b, 1, cin), jnp.bfloat16)
        xm = jnp.concatenate([zrow, xb[:, :tp - 1, :]], axis=1)   # x[t-1]; zero at t == 0
        xp = jnp.concatenate([xb[:, 1:, :], zrow], axis=1)        # x[t+1]; zero at t == tp-1
        xcat = jnp.concatenate([xm, xb, xp], axis=-1).reshape(b * tp, 3 * cin)
        y = jnp.dot(xcat, wf_ref[...], preferred_element_type=jnp.float32)
        return (y + b_ref[...]).reshape(b, tp, -1)

    def conv1(x3, w_ref, b_ref):
        b, tp, cin = x3.shape
        y = jnp.dot(x3.reshape(b * tp, cin).astype(jnp.bfloat16), w_ref[...],
                    preferred_element_type=jnp.float32)
        return (y + b_ref[...]).reshape(b, tp, -1)

    # text branch: relu(conv3) -> conv1.  Padded text rows enter as exact zeros, and the
    # k=1 conv does not mix time, so no re-zeroing is needed on this branch.
    t = jnp.maximum(conv3(text_ref[...], tw1_ref, tb1_ref), 0.0)
    t = conv1(t, tw2_ref, tb2_ref)                                # (bblk, ttp, adim) f32

    # feats branch: relu(conv3) -> relu(conv3) -> conv1.  Re-zero padded feats rows
    # between the two k=3 convs so the second conv sees the same zero padding as the
    # unpadded reference.
    f = jnp.maximum(conv3(feats_ref[...], fw1_ref, fb1_ref), 0.0)
    frow = lax.broadcasted_iota(jnp.int32, (tfp, 1), 0)           # (tfp, 1) row index
    f = jnp.where(frow < t_feats, f, 0.0)
    f = jnp.maximum(conv3(f, fw2_ref, fb2_ref), 0.0)
    f = conv1(f, fw3_ref, fb3_ref)                                # (bblk, tfp, adim) f32

    # pairwise L2 distance: d2[b,i,j] = ||f_bi||^2 + ||t_bj||^2 - 2 f_bi.t_bj.
    # Quantize both sides to bf16 ONCE so the cross matmul (dominant FLOP term, MXU bf16)
    # and the norm terms are computed from identical values -> d2 >= 0 up to f32 rounding.
    fb16 = f.astype(jnp.bfloat16)
    tb16 = t.astype(jnp.bfloat16)
    fq = fb16.astype(jnp.float32)
    tq = tb16.astype(jnp.float32)
    cross = jnp.einsum('bfc,btc->bft', fb16, tb16,
                       preferred_element_type=jnp.float32)        # (bblk, tfp, ttp)
    fn2 = jnp.sum(fq * fq, axis=-1, keepdims=True)                # (bblk, tfp, 1)
    ones = jnp.ones((bblk, 1, adim), jnp.float32)
    tn2 = jnp.einsum('bxc,btc->bxt', ones, tq * tq,
                     preferred_element_type=jnp.float32)          # (bblk, 1, ttp)
    d2 = jnp.maximum(fn2 + tn2 - 2.0 * cross, 0.0)
    score = -jnp.sqrt(d2)

    # masked_fill(x_masks > 0, -inf); padded text columns arrive pre-masked from the wrapper.
    score = jnp.where(mask_ref[...] > 0.0, -jnp.inf, score)

    # log_softmax over the (padded, lane-dense) T_text axis — f32 throughout.
    m = jnp.max(score, axis=-1, keepdims=True)
    z = jnp.exp(score - m)
    lse = jnp.log(jnp.sum(z, axis=-1, keepdims=True)) + m
    out_ref[...] = score - lse


# ----------------------------- wrapper -----------------------------------------------

def forced_aligner_forward(text, feats, params, x_masks=None):
    """text: (B, adim, T_text), feats: (B, odim, T_feats) -> log_p_attn (B, T_feats, T_text)."""
    B, adim, T_text = text.shape
    _, odim, T_feats = feats.shape

    ttp = _round_up(T_text, 128)    # lane-dense output columns (unmasked vst)
    tfp = _round_up(T_feats, 8)     # sublane-aligned rows

    # ---- generation-aware VMEM sizing -------------------------------------------------
    try:
        vmem_cap = int(pltpu.get_tpu_info().vmem_capacity_bytes)
        if vmem_cap <= 0:
            raise ValueError("bad vmem capacity")
    except Exception:                               # interpret mode / no hw info
        vmem_cap = 64 * 2 ** 20                     # conservative: v7x per-core VMEM

    # per-sample working set (inputs + conv intermediates + (Tf,Tt) epilogue slabs, f32)
    per_sample = 4 * (3 * ttp * adim + 5 * tfp * adim + 2 * tfp * odim
                      + 2 * ttp + 7 * tfp * ttp)
    budget = int(0.40 * vmem_cap)
    # keep >= 2 grid steps so both TensorCores get work on dual-TC parts (v7x)
    bblk = max(1, min(32, B, _cdiv(B, 2), budget // max(per_sample, 1)))
    b_pad = _round_up(B, bblk)

    # ---- layout: NCL -> channels-last, pad T axes and batch ----------------------------
    text_l = jnp.transpose(text, (0, 2, 1)).astype(jnp.float32)
    feats_l = jnp.transpose(feats, (0, 2, 1)).astype(jnp.float32)
    text_p = jnp.pad(text_l, ((0, b_pad - B), (0, ttp - T_text), (0, 0)))
    feats_p = jnp.pad(feats_l, ((0, b_pad - B), (0, tfp - T_feats), (0, 0)))

    if x_masks is None:
        mask = jnp.zeros((B, 1, T_text), jnp.float32)
    else:
        mask = x_masks.astype(jnp.float32).reshape(B, 1, T_text)
    # padded text columns are always masked (-inf) so they never affect the softmax
    mask_p = jnp.pad(mask, ((0, 0), (0, 0), (0, ttp - T_text)), constant_values=1.0)
    mask_p = jnp.pad(mask_p, ((0, b_pad - B), (0, 0), (0, 0)))

    # ---- weights: fuse the 3 conv taps into (3*Cin, Cout), ship in bf16 ----------------
    tw1, tb1, tw2, tb2, fw1, fb1, fw2, fb2, fw3, fb3 = params

    def fuse(w):                                    # (k, Cin, Cout) -> (k*Cin, Cout) bf16
        k, cin, cout = w.shape
        return w.reshape(k * cin, cout).astype(jnp.bfloat16)

    wargs = (fuse(tw1), tb1.astype(jnp.float32),
             fuse(tw2), tb2.astype(jnp.float32),
             fuse(fw1), fb1.astype(jnp.float32),
             fuse(fw2), fb2.astype(jnp.float32),
             fuse(fw3), fb3.astype(jnp.float32))

    # ---- specs -------------------------------------------------------------------------
    def batched_spec(shape):
        blk = (bblk,) + tuple(shape[1:])
        nz = len(shape) - 1
        return pl.BlockSpec(blk, lambda g, _nz=nz: (g,) + (0,) * _nz)

    def full_spec(a):
        nd = a.ndim
        return pl.BlockSpec(a.shape, lambda g, _nd=nd: (0,) * _nd)

    in_specs = ([batched_spec(text_p.shape), batched_spec(feats_p.shape),
                 batched_spec(mask_p.shape)]
                + [full_spec(a) for a in wargs])
    out_spec = pl.BlockSpec((bblk, tfp, ttp), lambda g: (g, 0, 0))

    grid_spec = pltpu.PrefetchScalarGridSpec(
        num_scalar_prefetch=0,
        grid=(b_pad // bblk,),
        in_specs=in_specs,
        out_specs=out_spec,
    )

    # ---- vmem limit (<= 75% of physical) + advisory cost estimate ----------------------
    w_bytes = sum(int(np.prod(a.shape)) * a.dtype.itemsize for a in wargs)
    need = 2 * bblk * per_sample + 4 * w_bytes
    vmem_limit = int(min(int(0.75 * vmem_cap), max(32 * 2 ** 20, need)))

    conv_flops = 2 * b_pad * (ttp * (3 * adim + adim) * adim
                              + tfp * (3 * odim + 3 * adim + adim) * adim)
    cross_flops = 2 * b_pad * tfp * ttp * adim
    flops = int(conv_flops + cross_flops + 6 * b_pad * tfp * ttp)
    transcend = int(2 * b_pad * tfp * ttp + b_pad * tfp)
    bytes_accessed = int(4 * (text_p.size + feats_p.size + mask_p.size)
                         + w_bytes + 4 * b_pad * tfp * ttp)

    kernel = functools.partial(aligner_kernel, t_feats=T_feats)

    out_p = pl.pallas_call(
        kernel,
        out_shape=jax.ShapeDtypeStruct((b_pad, tfp, ttp), jnp.float32),
        grid_spec=grid_spec,
        compiler_params=pltpu.CompilerParams(
            dimension_semantics=("parallel",),
            vmem_limit_bytes=vmem_limit),
        cost_estimate=pl.CostEstimate(flops=flops, transcendentals=transcend,
                                      bytes_accessed=bytes_accessed),
    )(text_p, feats_p, mask_p, *wargs)

    return out_p[:B, :T_feats, :T_text]


# ----------------------------- deterministic params ----------------------------------

def init_params(key, adim, odim):
    ks = jax.random.split(key, 10)

    def w(k, shape, fan_in):
        return jax.random.normal(k, shape, jnp.float32) / np.sqrt(float(fan_in))

    tw1 = w(ks[0], (3, adim, adim), 3 * adim)   # t_conv1 (k=3)
    tb1 = w(ks[1], (1, adim), adim)
    tw2 = w(ks[2], (1, adim, adim), adim)       # t_conv2 (k=1)
    tb2 = w(ks[3], (1, adim), adim)
    fw1 = w(ks[4], (3, odim, adim), 3 * odim)   # f_conv1 (k=3, odim -> adim)
    fb1 = w(ks[5], (1, adim), adim)
    fw2 = w(ks[6], (3, adim, adim), 3 * adim)   # f_conv2 (k=3)
    fb2 = w(ks[7], (1, adim), adim)
    fw3 = w(ks[8], (1, adim, adim), adim)       # f_conv3 (k=1)
    fb3 = w(ks[9], (1, adim), adim)
    return (tw1, tb1, tw2, tb2, fw1, fb1, fw2, fb2, fw3, fb3)


# ----------------------------- pure-JAX reference ------------------------------------

def _conv1d_ref(x, w, b):
    # x: (B, T, Cin), w: (k, Cin, Cout), b: (1, Cout)
    if w.shape[0] == 3:
        xp = jnp.pad(x, ((0, 0), (1, 1), (0, 0)))
        y = xp[:, :-2] @ w[0] + xp[:, 1:-1] @ w[1] + xp[:, 2:] @ w[2]
    else:
        y = x @ w[0]
    return y + b[None]


def reference_forward(text, feats, params, x_masks=None):
    text_l = jnp.transpose(text, (0, 2, 1))
    feats_l = jnp.transpose(feats, (0, 2, 1))
    tw1, tb1, tw2, tb2, fw1, fb1, fw2, fb2, fw3, fb3 = params
    t = jax.nn.relu(_conv1d_ref(text_l, tw1, tb1))
    t = _conv1d_ref(t, tw2, tb2)
    f = jax.nn.relu(_conv1d_ref(feats_l, fw1, fb1))
    f = jax.nn.relu(_conv1d_ref(f, fw2, fb2))
    f = _conv1d_ref(f, fw3, fb3)
    diff = f[:, :, None, :] - t[:, None, :, :]
    dist = jnp.sqrt(jnp.sum(diff * diff, axis=-1))
    score = -dist
    if x_masks is not None:
        score = jnp.where(x_masks > 0.0, -jnp.inf, score)
    return jax.nn.log_softmax(score, axis=-1)


if __name__ == "__main__":
    key = jax.random.PRNGKey(0)
    B, adim, odim = 2, 32, 24
    T_text, T_feats = 16, 24

    k_t, k_f, k_p = jax.random.split(key, 3)
    text = jax.random.normal(k_t, (B, adim, T_text), jnp.float32)    # (B, adim, T_text)
    feats = jax.random.normal(k_f, (B, odim, T_feats), jnp.float32)  # (B, odim, T_feats)
    params = init_params(k_p, adim, odim)

    # padding mask (1.0 at positions >= text length); forward masks where mask > 0
    text_lengths = jnp.array([16, 11], jnp.int32)
    x_masks = (jnp.arange(T_text)[None, :] >= text_lengths[:, None]
               ).astype(jnp.float32)[:, None, :]                     # (B, 1, T_text)

    out = forced_aligner_forward(text, feats, params, x_masks)
    out = jax.block_until_ready(out)

    ref = reference_forward(text, feats, params, x_masks)
    # Conv + cross matmuls feed the MXU with bf16 operands (f32 accumulation, f32
    # distance/softmax epilogue); tolerance reflects bf16 inputs vs the f32 reference.
    np.testing.assert_allclose(np.asarray(out), np.asarray(ref), rtol=5e-2, atol=5e-2)
    assert out.shape == (B, T_feats, T_text)
    print("KERNEL_OK")
</pallas_src>

<mosaic_0001>
module attributes {stable_mosaic.version = 11 : i64} {
  func.func @aligner_kernel(%arg0: i32, %arg1: memref<1x128x32xf32, #tpu.memory_space<vmem>>, %arg2: memref<1x24x24xf32, #tpu.memory_space<vmem>>, %arg3: memref<1x1x128xf32, #tpu.memory_space<vmem>>, %arg4: memref<96x32xbf16, #tpu.memory_space<vmem>>, %arg5: memref<1x32xf32, #tpu.memory_space<vmem>>, %arg6: memref<32x32xbf16, #tpu.memory_space<vmem>>, %arg7: memref<1x32xf32, #tpu.memory_space<vmem>>, %arg8: memref<72x32xbf16, #tpu.memory_space<vmem>>, %arg9: memref<1x32xf32, #tpu.memory_space<vmem>>, %arg10: memref<96x32xbf16, #tpu.memory_space<vmem>>, %arg11: memref<1x32xf32, #tpu.memory_space<vmem>>, %arg12: memref<32x32xbf16, #tpu.memory_space<vmem>>, %arg13: memref<1x32xf32, #tpu.memory_space<vmem>>, %arg14: memref<1x24x128xf32, #tpu.memory_space<vmem>>) attributes {dimension_semantics = [#tpu.dimension_semantics<parallel>], iteration_bounds = array<i64: 2>, scalar_prefetch = 0 : i64, scratch_operands = 0 : i64, tpu.core_type = #tpu.core_type<tc>, window_params = [{transform_indices = @transform_0, window_bounds = array<i64: 1, 128, 32>}, {transform_indices = @transform_1, window_bounds = array<i64: 1, 24, 24>}, {transform_indices = @transform_2, window_bounds = array<i64: 1, 1, 128>}, {pipeline_mode = #tpu.pipeline_mode<synchronous>, transform_indices = @transform_3, window_bounds = array<i64: 96, 32>}, {pipeline_mode = #tpu.pipeline_mode<synchronous>, transform_indices = @transform_4, window_bounds = array<i64: 1, 32>}, {pipeline_mode = #tpu.pipeline_mode<synchronous>, transform_indices = @transform_5, window_bounds = array<i64: 32, 32>}, {pipeline_mode = #tpu.pipeline_mode<synchronous>, transform_indices = @transform_6, window_bounds = array<i64: 1, 32>}, {pipeline_mode = #tpu.pipeline_mode<synchronous>, transform_indices = @transform_7, window_bounds = array<i64: 72, 32>}, {pipeline_mode = #tpu.pipeline_mode<synchronous>, transform_indices = @transform_8, window_bounds = array<i64: 1, 32>}, {pipeline_mode = #tpu.pipeline_mode<synchronous>, transform_indices = @transform_9, window_bounds = array<i64: 96, 32>}, {pipeline_mode = #tpu.pipeline_mode<synchronous>, transform_indices = @transform_10, window_bounds = array<i64: 1, 32>}, {pipeline_mode = #tpu.pipeline_mode<synchronous>, transform_indices = @transform_11, window_bounds = array<i64: 32, 32>}, {pipeline_mode = #tpu.pipeline_mode<synchronous>, transform_indices = @transform_12, window_bounds = array<i64: 1, 32>}, {transform_indices = @transform_13, window_bounds = array<i64: 1, 24, 128>}]} {
    %c0 = arith.constant 0 : index
    %c0_0 = arith.constant 0 : index
    %c0_1 = arith.constant 0 : index
    %0 = vector.load %arg1[%c0, %c0_0, %c0_1] : memref<1x128x32xf32, #tpu.memory_space<vmem>>, vector<1x128x32xf32>
    %1 = arith.truncf %0 : vector<1x128x32xf32> to vector<1x128x32xbf16>
    %cst = arith.constant 0.000000e+00 : bf16
    %2 = vector.broadcast %cst : bf16 to vector<1x1x32xbf16>
    %3 = vector.extract_strided_slice %1 {offsets = [0, 0, 0], sizes = [1, 127, 32], strides = [1, 1, 1]} : vector<1x128x32xbf16> to vector<1x127x32xbf16>
    %4 = tpu.concatenate %2, %3 in 1 : vector<1x1x32xbf16>, vector<1x127x32xbf16> -> vector<1x128x32xbf16>
    %5 = vector.extract_strided_slice %1 {offsets = [0, 1, 0], sizes = [1, 127, 32], strides = [1, 1, 1]} : vector<1x128x32xbf16> to vector<1x127x32xbf16>
    %6 = tpu.concatenate %5, %2 in 1 : vector<1x127x32xbf16>, vector<1x1x32xbf16> -> vector<1x128x32xbf16>
    %7 = tpu.concatenate %4, %1, %6 in 2 : vector<1x128x32xbf16>, vector<1x128x32xbf16>, vector<1x128x32xbf16> -> vector<1x128x96xbf16>
    %8 = vector.shape_cast %7 : vector<1x128x96xbf16> to vector<128x96xbf16>
    %c0_2 = arith.constant 0 : index
    %c0_3 = arith.constant 0 : index
    %9 = vector.load %arg4[%c0_2, %c0_3] : memref<96x32xbf16, #tpu.memory_space<vmem>>, vector<96x32xbf16>
    %cst_4 = arith.constant dense<0.000000e+00> : vector<128x32xf32>
    %10 = tpu.matmul %8, %9, %cst_4 {dimension_numbers = #tpu.dot_dimension_numbers<[1], [0], [0], [1], [0, 0, 1, 1], [], []>} : vector<128x96xbf16>, vector<96x32xbf16>, vector<128x32xf32> -> vector<128x32xf32>
    %c0_5 = arith.constant 0 : index
    %c0_6 = arith.constant 0 : index
    %11 = vector.load %arg5[%c0_5, %c0_6] : memref<1x32xf32, #tpu.memory_space<vmem>>, vector<1x32xf32>
    %12 = vector.broadcast %11 : vector<1x32xf32> to vector<128x32xf32>
    %13 = arith.addf %10, %12 : vector<128x32xf32>
    %14 = vector.shape_cast %13 : vector<128x32xf32> to vector<1x128x32xf32>
    %cst_7 = arith.constant 0.000000e+00 : f32
    %15 = vector.broadcast %cst_7 : f32 to vector<1x128x32xf32>
    %16 = arith.maximumf %14, %15 : vector<1x128x32xf32>
    %17 = vector.shape_cast %16 : vector<1x128x32xf32> to vector<128x32xf32>
    %18 = arith.truncf %17 : vector<128x32xf32> to vector<128x32xbf16>
    %c0_8 = arith.constant 0 : index
    %c0_9 = arith.constant 0 : index
    %19 = vector.load %arg6[%c0_8, %c0_9] : memref<32x32xbf16, #tpu.memory_space<vmem>>, vector<32x32xbf16>
    %cst_10 = arith.constant dense<0.000000e+00> : vector<128x32xf32>
    %20 = tpu.matmul %18, %19, %cst_10 {dimension_numbers = #tpu.dot_dimension_numbers<[1], [0], [0], [1], [0, 0, 1, 1], [], []>} : vector<128x32xbf16>, vector<32x32xbf16>, vector<128x32xf32> -> vector<128x32xf32>
    %c0_11 = arith.constant 0 : index
    %c0_12 = arith.constant 0 : index
    %21 = vector.load %arg7[%c0_11, %c0_12] : memref<1x32xf32, #tpu.memory_space<vmem>>, vector<1x32xf32>
    %22 = vector.broadcast %21 : vector<1x32xf32> to vector<128x32xf32>
    %23 = arith.addf %20, %22 : vector<128x32xf32>
    %24 = vector.shape_cast %23 : vector<128x32xf32> to vector<1x128x32xf32>
    %c0_13 = arith.constant 0 : index
    %c0_14 = arith.constant 0 : index
    %c0_15 = arith.constant 0 : index
    %25 = vector.load %arg2[%c0_13, %c0_14, %c0_15] : memref<1x24x24xf32, #tpu.memory_space<vmem>>, vector<1x24x24xf32>
    %26 = arith.truncf %25 : vector<1x24x24xf32> to vector<1x24x24xbf16>
    %cst_16 = arith.constant 0.000000e+00 : bf16
    %27 = vector.broadcast %cst_16 : bf16 to vector<1x1x24xbf16>
    %28 = vector.extract_strided_slice %26 {offsets = [0, 0, 0], sizes = [1, 23, 24], strides = [1, 1, 1]} : vector<1x24x24xbf16> to vector<1x23x24xbf16>
    %29 = tpu.concatenate %27, %28 in 1 : vector<1x1x24xbf16>, vector<1x23x24xbf16> -> vector<1x24x24xbf16>
    %30 = vector.extract_strided_slice %26 {offsets = [0, 1, 0], sizes = [1, 23, 24], strides = [1, 1, 1]} : vector<1x24x24xbf16> to vector<1x23x24xbf16>
    %31 = tpu.concatenate %30, %27 in 1 : vector<1x23x24xbf16>, vector<1x1x24xbf16> -> vector<1x24x24xbf16>
    %32 = tpu.concatenate %29, %26, %31 in 2 : vector<1x24x24xbf16>, vector<1x24x24xbf16>, vector<1x24x24xbf16> -> vector<1x24x72xbf16>
    %33 = vector.shape_cast %32 : vector<1x24x72xbf16> to vector<24x72xbf16>
    %c0_17 = arith.constant 0 : index
    %c0_18 = arith.constant 0 : index
    %34 = vector.load %arg8[%c0_17, %c0_18] : memref<72x32xbf16, #tpu.memory_space<vmem>>, vector<72x32xbf16>
    %cst_19 = arith.constant dense<0.000000e+00> : vector<24x32xf32>
    %35 = tpu.matmul %33, %34, %cst_19 {dimension_numbers = #tpu.dot_dimension_numbers<[1], [0], [0], [1], [0, 0, 1, 1], [], []>} : vector<24x72xbf16>, vector<72x32xbf16>, vector<24x32xf32> -> vector<24x32xf32>
    %c0_20 = arith.constant 0 : index
    %c0_21 = arith.constant 0 : index
    %36 = vector.load %arg9[%c0_20, %c0_21] : memref<1x32xf32, #tpu.memory_space<vmem>>, vector<1x32xf32>
    %37 = vector.broadcast %36 : vector<1x32xf32> to vector<24x32xf32>
    %38 = arith.addf %35, %37 : vector<24x32xf32>
    %39 = vector.shape_cast %38 : vector<24x32xf32> to vector<1x24x32xf32>
    %cst_22 = arith.constant 0.000000e+00 : f32
    %40 = vector.broadcast %cst_22 : f32 to vector<1x24x32xf32>
    %41 = arith.maximumf %39, %40 : vector<1x24x32xf32>
    %42 = tpu.iota {dimensions = array<i32: 0>} : vector<24x1xi32>
    %c24_i32 = arith.constant 24 : i32
    %43 = vector.broadcast %c24_i32 : i32 to vector<24x1xi32>
    %44 = arith.cmpi slt, %42, %43 : vector<24x1xi32>
    %cst_23 = arith.constant 0.000000e+00 : f32
    %45 = vector.shape_cast %44 : vector<24x1xi1> to vector<1x24x1xi1>
    %46 = vector.broadcast %45 : vector<1x24x1xi1> to vector<1x24x32xi1>
    %47 = vector.broadcast %cst_23 : f32 to vector<1x24x32xf32>
    %48 = arith.select %46, %41, %47 : vector<1x24x32xi1>, vector<1x24x32xf32>
    %49 = arith.truncf %48 : vector<1x24x32xf32> to vector<1x24x32xbf16>
    %cst_24 = arith.constant 0.000000e+00 : bf16
    %50 = vector.broadcast %cst_24 : bf16 to vector<1x1x32xbf16>
    %51 = vector.extract_strided_slice %49 {offsets = [0, 0, 0], sizes = [1, 23, 32], strides = [1, 1, 1]} : vector<1x24x32xbf16> to vector<1x23x32xbf16>
    %52 = tpu.concatenate %50, %51 in 1 : vector<1x1x32xbf16>, vector<1x23x32xbf16> -> vector<1x24x32xbf16>
    %53 = vector.extract_strided_slice %49 {offsets = [0, 1, 0], sizes = [1, 23, 32], strides = [1, 1, 1]} : vector<1x24x32xbf16> to vector<1x23x32xbf16>
    %54 = tpu.concatenate %53, %50 in 1 : vector<1x23x32xbf16>, vector<1x1x32xbf16> -> vector<1x24x32xbf16>
    %55 = tpu.concatenate %52, %49, %54 in 2 : vector<1x24x32xbf16>, vector<1x24x32xbf16>, vector<1x24x32xbf16> -> vector<1x24x96xbf16>
    %56 = vector.shape_cast %55 : vector<1x24x96xbf16> to vector<24x96xbf16>
    %c0_25 = arith.constant 0 : index
    %c0_26 = arith.constant 0 : index
    %57 = vector.load %arg10[%c0_25, %c0_26] : memref<96x32xbf16, #tpu.memory_space<vmem>>, vector<96x32xbf16>
    %cst_27 = arith.constant dense<0.000000e+00> : vector<24x32xf32>
    %58 = tpu.matmul %56, %57, %cst_27 {dimension_numbers = #tpu.dot_dimension_numbers<[1], [0], [0], [1], [0, 0, 1, 1], [], []>} : vector<24x96xbf16>, vector<96x32xbf16>, vector<24x32xf32> -> vector<24x32xf32>
    %c0_28 = arith.constant 0 : index
    %c0_29 = arith.constant 0 : index
    %59 = vector.load %arg11[%c0_28, %c0_29] : memref<1x32xf32, #tpu.memory_space<vmem>>, vector<1x32xf32>
    %60 = vector.broadcast %59 : vector<1x32xf32> to vector<24x32xf32>
    %61 = arith.addf %58, %60 : vector<24x32xf32>
    %62 = vector.shape_cast %61 : vector<24x32xf32> to vector<1x24x32xf32>
    %cst_30 = arith.constant 0.000000e+00 : f32
    %63 = vector.broadcast %cst_30 : f32 to vector<1x24x32xf32>
    %64 = arith.maximumf %62, %63 : vector<1x24x32xf32>
    %65 = vector.shape_cast %64 : vector<1x24x32xf32> to vector<24x32xf32>
    %66 = arith.truncf %65 : vector<24x32xf32> to vector<24x32xbf16>
    %c0_31 = arith.constant 0 : index
    %c0_32 = arith.constant 0 : index
    %67 = vector.load %arg12[%c0_31, %c0_32] : memref<32x32xbf16, #tpu.memory_space<vmem>>, vector<32x32xbf16>
    %cst_33 = arith.constant dense<0.000000e+00> : vector<24x32xf32>
    %68 = tpu.matmul %66, %67, %cst_33 {dimension_numbers = #tpu.dot_dimension_numbers<[1], [0], [0], [1], [0, 0, 1, 1], [], []>} : vector<24x32xbf16>, vector<32x32xbf16>, vector<24x32xf32> -> vector<24x32xf32>
    %c0_34 = arith.constant 0 : index
    %c0_35 = arith.constant 0 : index
    %69 = vector.load %arg13[%c0_34, %c0_35] : memref<1x32xf32, #tpu.memory_space<vmem>>, vector<1x32xf32>
    %70 = vector.broadcast %69 : vector<1x32xf32> to vector<24x32xf32>
    %71 = arith.addf %68, %70 : vector<24x32xf32>
    %72 = vector.shape_cast %71 : vector<24x32xf32> to vector<1x24x32xf32>
    %73 = arith.truncf %72 : vector<1x24x32xf32> to vector<1x24x32xbf16>
    %74 = arith.truncf %24 : vector<1x128x32xf32> to vector<1x128x32xbf16>
    %75 = arith.extf %73 : vector<1x24x32xbf16> to vector<1x24x32xf32>
    %76 = arith.extf %74 : vector<1x128x32xbf16> to vector<1x128x32xf32>
    "tpu.trace_start"() <{level = 10 : i32, message = "bfc,btc->bft"}> : () -> ()
    %cst_36 = arith.constant dense<0.000000e+00> : vector<1x24x128xf32>
    %77 = tpu.matmul %73, %74, %cst_36 {dimension_numbers = #tpu.dot_dimension_numbers<[2], [2], [1], [1], [0, 0, 0, 1, 1, 1], [0], [0]>} : vector<1x24x32xbf16>, vector<1x128x32xbf16>, vector<1x24x128xf32> -> vector<1x24x128xf32>
    "tpu.trace_stop"() : () -> ()
    %78 = arith.mulf %75, %75 : vector<1x24x32xf32>
    %cst_37 = arith.constant dense<0.000000e+00> : vector<1x24xf32>
    %79 = vector.multi_reduction <add>, %78, %cst_37 [2] : vector<1x24x32xf32> to vector<1x24xf32>
    %80 = vector.shape_cast %79 : vector<1x24xf32> to vector<1x24x1xf32>
    %cst_38 = arith.constant 1.000000e+00 : f32
    %81 = vector.broadcast %cst_38 : f32 to vector<1x1x32xf32>
    %82 = arith.mulf %76, %76 : vector<1x128x32xf32>
    "tpu.trace_start"() <{level = 10 : i32, message = "bxc,btc->bxt"}> : () -> ()
    %cst_39 = arith.constant dense<0.000000e+00> : vector<1x1x128xf32>
    %83 = tpu.matmul %81, %82, %cst_39 {dimension_numbers = #tpu.dot_dimension_numbers<[2], [2], [1], [1], [0, 0, 0, 1, 1, 1], [0], [0]>} : vector<1x1x32xf32>, vector<1x128x32xf32>, vector<1x1x128xf32> -> vector<1x1x128xf32>
    "tpu.trace_stop"() : () -> ()
    %84 = vector.broadcast %80 : vector<1x24x1xf32> to vector<1x24x128xf32>
    %85 = vector.broadcast %83 : vector<1x1x128xf32> to vector<1x24x128xf32>
    %86 = arith.addf %84, %85 : vector<1x24x128xf32>
    %cst_40 = arith.constant 2.000000e+00 : f32
    %87 = vector.broadcast %cst_40 : f32 to vector<1x24x128xf32>
    %88 = arith.mulf %87, %77 : vector<1x24x128xf32>
    %89 = arith.subf %86, %88 : vector<1x24x128xf32>
    %cst_41 = arith.constant 0.000000e+00 : f32
    %90 = vector.broadcast %cst_41 : f32 to vector<1x24x128xf32>
    %91 = arith.maximumf %89, %90 : vector<1x24x128xf32>
    %92 = math.sqrt %91 : vector<1x24x128xf32>
    %cst_42 = arith.constant 0.000000e+00 : f32
    %93 = vector.broadcast %cst_42 : f32 to vector<1x24x128xf32>
    %94 = arith.subf %93, %92 : vector<1x24x128xf32>
    %c0_43 = arith.constant 0 : index
    %c0_44 = arith.constant 0 : index
    %c0_45 = arith.constant 0 : index
    %95 = vector.load %arg3[%c0_43, %c0_44, %c0_45] : memref<1x1x128xf32, #tpu.memory_space<vmem>>, vector<1x1x128xf32>
    %cst_46 = arith.constant 0.000000e+00 : f32
    %96 = vector.broadcast %cst_46 : f32 to vector<1x1x128xf32>
    %97 = arith.cmpf ogt, %95, %96 : vector<1x1x128xf32>
    %cst_47 = arith.constant 0xFF800000 : f32
    %98 = vector.shape_cast %97 : vector<1x1x128xi1> to vector<1x1x128xi1>
    %99 = vector.broadcast %98 : vector<1x1x128xi1> to vector<1x24x128xi1>
    %100 = vector.broadcast %cst_47 : f32 to vector<1x24x128xf32>
    %101 = arith.select %99, %100, %94 : vector<1x24x128xi1>, vector<1x24x128xf32>
    %cst_48 = arith.constant dense<0xFF800000> : vector<1x24xf32>
    %102 = vector.multi_reduction <maximumf>, %101, %cst_48 [2] : vector<1x24x128xf32> to vector<1x24xf32>
    %103 = vector.shape_cast %102 : vector<1x24xf32> to vector<1x24x1xf32>
    %104 = vector.broadcast %103 : vector<1x24x1xf32> to vector<1x24x128xf32>
    %105 = arith.subf %101, %104 : vector<1x24x128xf32>
    %106 = math.exp %105 : vector<1x24x128xf32>
    %cst_49 = arith.constant dense<0.000000e+00> : vector<1x24xf32>
    %107 = vector.multi_reduction <add>, %106, %cst_49 [2] : vector<1x24x128xf32> to vector<1x24xf32>
    %108 = vector.shape_cast %107 : vector<1x24xf32> to vector<1x24x1xf32>
    %109 = math.log %108 : vector<1x24x1xf32>
    %110 = arith.addf %109, %103 : vector<1x24x1xf32>
    %111 = vector.broadcast %110 : vector<1x24x1xf32> to vector<1x24x128xf32>
    %112 = arith.subf %101, %111 : vector<1x24x128xf32>
    %c0_50 = arith.constant 0 : index
    %c0_51 = arith.constant 0 : index
    %c0_52 = arith.constant 0 : index
    %113 = vector.load %arg14[%c0_50, %c0_51, %c0_52] : memref<1x24x128xf32, #tpu.memory_space<vmem>>, vector<1x24x128xf32>
    tpu.vector_store %arg14[%c0_50, %c0_51, %c0_52], %112 {strides = array<i32>} : memref<1x24x128xf32, #tpu.memory_space<vmem>>, vector<1x24x128xf32>,
    return
  }
  func.func @transform_0(%arg0: i32) -> (i32, i32, i32) {
    %c0_i32 = arith.constant 0 : i32
    %c0_i32_0 = arith.constant 0 : i32
    %c0_i32_1 = arith.constant 0 : i32
    return %arg0, %c0_i32, %c0_i32_0 : i32, i32, i32
  }
  func.func @transform_1(%arg0: i32) -> (i32, i32, i32) {
    %c0_i32 = arith.constant 0 : i32
    %c0_i32_0 = arith.constant 0 : i32
    %c0_i32_1 = arith.constant 0 : i32
    return %arg0, %c0_i32, %c0_i32_0 : i32, i32, i32
  }
  func.func @transform_2(%arg0: i32) -> (i32, i32, i32) {
    %c0_i32 = arith.constant 0 : i32
    %c0_i32_0 = arith.constant 0 : i32
    %c0_i32_1 = arith.constant 0 : i32
    return %arg0, %c0_i32, %c0_i32_0 : i32, i32, i32
  }
  func.func @transform_3(%arg0: i32) -> (i32, i32) {
    %c0_i32 = arith.constant 0 : i32
    %c0_i32_0 = arith.constant 0 : i32
    %c0_i32_1 = arith.constant 0 : i32
    return %c0_i32, %c0_i32_0 : i32, i32
  }
  func.func @transform_4(%arg0: i32) -> (i32, i32) {
    %c0_i32 = arith.constant 0 : i32
    %c0_i32_0 = arith.constant 0 : i32
    %c0_i32_1 = arith.constant 0 : i32
    return %c0_i32, %c0_i32_0 : i32, i32
  }
  func.func @transform_5(%arg0: i32) -> (i32, i32) {
    %c0_i32 = arith.constant 0 : i32
    %c0_i32_0 = arith.constant 0 : i32
    %c0_i32_1 = arith.constant 0 : i32
    return %c0_i32, %c0_i32_0 : i32, i32
  }
  func.func @transform_6(%arg0: i32) -> (i32, i32) {
    %c0_i32 = arith.constant 0 : i32
    %c0_i32_0 = arith.constant 0 : i32
    %c0_i32_1 = arith.constant 0 : i32
    return %c0_i32, %c0_i32_0 : i32, i32
  }
  func.func @transform_7(%arg0: i32) -> (i32, i32) {
    %c0_i32 = arith.constant 0 : i32
    %c0_i32_0 = arith.constant 0 : i32
    %c0_i32_1 = arith.constant 0 : i32
    return %c0_i32, %c0_i32_0 : i32, i32
  }
  func.func @transform_8(%arg0: i32) -> (i32, i32) {
    %c0_i32 = arith.constant 0 : i32
    %c0_i32_0 = arith.constant 0 : i32
    %c0_i32_1 = arith.constant 0 : i32
    return %c0_i32, %c0_i32_0 : i32, i32
  }
  func.func @transform_9(%arg0: i32) -> (i32, i32) {
    %c0_i32 = arith.constant 0 : i32
    %c0_i32_0 = arith.constant 0 : i32
    %c0_i32_1 = arith.constant 0 : i32
    return %c0_i32, %c0_i32_0 : i32, i32
  }
  func.func @transform_10(%arg0: i32) -> (i32, i32) {
    %c0_i32 = arith.constant 0 : i32
    %c0_i32_0 = arith.constant 0 : i32
    %c0_i32_1 = arith.constant 0 : i32
    return %c0_i32, %c0_i32_0 : i32, i32
  }
  func.func @transform_11(%arg0: i32) -> (i32, i32) {
    %c0_i32 = arith.constant 0 : i32
    %c0_i32_0 = arith.constant 0 : i32
    %c0_i32_1 = arith.constant 0 : i32
    return %c0_i32, %c0_i32_0 : i32, i32
  }
  func.func @transform_12(%arg0: i32) -> (i32, i32) {
    %c0_i32 = arith.constant 0 : i32
    %c0_i32_0 = arith.constant 0 : i32
    %c0_i32_1 = arith.constant 0 : i32
    return %c0_i32, %c0_i32_0 : i32, i32
  }
  func.func @transform_13(%arg0: i32) -> (i32, i32, i32) {
    %c0_i32 = arith.constant 0 : i32
    %c0_i32_0 = arith.constant 0 : i32
    %c0_i32_1 = arith.constant 0 : i32
    return %arg0, %c0_i32, %c0_i32_0 : i32, i32, i32
  }
}

</mosaic_0001>

<bundles_post_ra>
// kernel: tpu_custom_call.1
= control target key start
LH: loop header
LB: loop body
LE: loop exit
PB: predicated region body
PF: predicated region fallthrough
CT: control target
= control target key end

     0   :  { %s2610_s0 = inlined_call_operand.vmem [shape: f32[2,128,32], index: 0, kind: input, shape index: {}]   ;;  %s2611_s1 = inlined_call_operand.vmem [shape: f32[2,24,24], index: 1, kind: input, shape index: {}]   ;;  %s2612_s2 = inlined_call_operand.vmem [shape: f32[2,1,128], index: 2, kind: input, shape index: {}]   ;;  %s2613_s3 = inlined_call_operand.vmem [shape: bf16[96,32], index: 3, kind: input, shape index: {}]   ;;  %s2614_s4 = inlined_call_operand.vmem [shape: f32[1,32], index: 4, kind: input, shape index: {}]   ;;  %s2615_s5 = inlined_call_operand.vmem [shape: bf16[32,32], index: 5, kind: input, shape index: {}]   ;;  %s2616_s6 = inlined_call_operand.vmem [shape: f32[1,32], index: 6, kind: input, shape index: {}]   ;;  %s2617_s7 = inlined_call_operand.vmem [shape: bf16[72,32], index: 7, kind: input, shape index: {}]   ;;  %s2618_s8 = inlined_call_operand.vmem [shape: f32[1,32], index: 8, kind: input, shape index: {}]   ;;  %s2619_s9 = inlined_call_operand.vmem [shape: bf16[96,32], index: 9, kind: input, shape index: {}]   ;;  %s2620_s10 = inlined_call_operand.vmem [shape: f32[1,32], index: 10, kind: input, shape index: {}]   ;;  %s2621_s11 = inlined_call_operand.vmem [shape: bf16[32,32], index: 11, kind: input, shape index: {}]   ;;  %s2622_s12 = inlined_call_operand.vmem [shape: f32[1,32], index: 12, kind: input, shape index: {}]   ;;  %s2623_s13 = inlined_call_operand.hbm [shape: f32[2,24,128], index: 13, kind: output, shape index: {}]  }
   0x1   :  { %2628 = sst [smem:[#allocation6_spill]] %s2610_s0 }
   0x2   :  { %2629 = sst [smem:[#allocation7_spill]] %s2611_s1 }
   0x3   :  { %2630 = sst [smem:[#allocation8_spill]] %s2612_s2 }
   0x4   :  { %18 = vsyncpa [#allocation3], 0 }
   0x5   :  { %20 = vsyncpa [#allocation3 + $0x1], 0  ;;  %s2072_s25 = smov 0   ;;  %s2074_s26 = smov 0  }
   0x6   :  { %s2076_s27 = smov 0   ;;  %s2078_s28 = smov 0  }
   0x7 LB: > { %s2093_s29 = sadd.s32 4294967295, %s1992_s28   ;;  %s1705_s30 = sadd.s32 4294967294, %s1992_s28   ;;  %s1992_s28 = sphi %s2078_s28, %s2649_s28   ;;  %s1988_s27 = sphi %s2076_s27, %s2648_s27   ;;  %s1984_s26 = sphi %s2074_s26, %s2647_s26   ;;  %s1980_s25 = sphi %s2072_s25, %s2646_s25  }
   0x8   : > { %s2097_s14 = sadd.s32 1, %s1992_s28   ;;  %s321_s15 = sadd.s32 1, %s1988_s27 }
   0x9   : > { %s318_s16 = ssub.s32 %s1992_s28, %s2097_s14  ;;  %p331_p0 = scmp.ne.s32.totalorder %s1988_s27, %s1984_s26 }
   0xa   : > { %p319_p1 = scmp.eq.s32.totalorder %s318_s16, 0  ;;  %p332_p2 = scmp.eq.s32.totalorder %s2093_s29, 1 }
   0xb   : > { %p337_p3 = scmp.ne.s32.totalorder %s1984_s26, %s1980_s25  ;;  %p338_p4 = scmp.eq.s32.totalorder %s1705_s30, 1 }
   0xc   : > { %s2108_s17 = scalar_select %p319_p1, %s1988_s27, %s321_s15  }
   0xd   : > { %p2110_p5 = por %p332_p2, %p331_p0  ;;  %p2114_p6 = por %p338_p4, %p337_p3 }
   0xe   : > { %2631 = sst [smem:[#allocation5_spill]] %s2108_s17  ;;  %p1708_p7 = scmp.ge.s32.totalorder %s1992_s28, 1 }
   0xf   : > { %p408_p8 = scmp.lt.s32.totalorder %s1992_s28, 3 }
  0x11   : > { %p409_p9 = pnand %p1708_p7, %p408_p8 }
  0x12   : > { %p460_p10 = scmp.lt.s32.totalorder (!%p409_p9), %s2093_s29, 1  ;;  %s2634_s0 = sld [smem:[#allocation6_spill]] (!%p409_p9) }
  0x13   : > { %412 = sbr.rel (%p409_p9) target bundleno = 1171 (0x493), region = 72  ;;  %s2635_s1 = sld [smem:[#allocation7_spill]] (!%p409_p9) }
  0x14   : > { %s2638_s15 = smov (!%p409_p9), 32   ;;  %s2642_s2 = sld [smem:[#allocation8_spill]] (!%p409_p9) }
  0x18   : > { %s2122_s20 = scalar_select %p460_p10, %s2093_s29, 1  ;;  %vm989_vm0 = vcmask 1043456   ;;  %vm990_vm1 = vsmask.f32 3328  ;;  %vm614_vm2 = vsmask.f32 7424 }
  0x19   : > { %vm2168_vm3 = vmand %vm989_vm0, %vm990_vm1  ;;  %vm639_vm4 = vcmask 1047552   ;;  %vm546_vm6 = vsmask.f32 256  ;;  %vm611_vm7 = vcmask 1040384   ;;  %vm675_vm9 = vcmask 261120  }
  0x1a   : > { %s1858_s21 = smul.u32 24, %s2122_s20  ;;  %s1836_s22 = sshll.u32 %s2122_s20, 7  ;;  %vm640_vm5 = vmand %vm639_vm4, %vm614_vm2  ;;  %vm700_vm10 = vcmask 523264   ;;  %vm769_vm11 = vcmask 785408   ;;  %vm1002_vm12 = vcmask 195584   ;;  %vm1009_vm13 = vcmask 392192  }
  0x1b   : > { %s2129_s30 = scalar_lea.vmem %s2634_s0, %s1836_s22  ;;  %s1996_s22 = smov 48   ;;  %vm2314_vm8 = vmand %vm611_vm7, %vm546_vm6  ;;  %vm1054_vm14 = vcmask 588800  }
  0x1c   : > { %s469_s17 = scalar_lea.vmem %s2635_s1, %s1858_s21  ;;  %v476_v0 = vld [vmem:[%s2129_s30 + $0x10] sm:$0xff]  ;;  %v477_v1 = vld [vmem:[%s2129_s30 + $0x18] sm:$0xff]  ;;  %v478_v2 = vld [vmem:[%s2129_s30 + $0x20] sm:$0xff]  ;;  %s2624_s21 = smov 32  }
  0x1d   : > { %v952_v3 = vld [vmem:[%s469_s17] sm:$0xff]  ;;  %v953_v4 = vld [vmem:[%s469_s17 + $0x8] sm:$0xff]  ;;  %v954_v5 = vld [vmem:[%s469_s17 + $0x10] sm:$0xff]  ;;  %v492_v6 = vpack.c.bf16 %v476_v0, %v476_v0  ;;  %v493_v7 = vpack.c.bf16 %v477_v1, %v477_v1  ;;  %v494_v8 = vpack.c.bf16 %v478_v2, %v478_v2  ;;  %s1994_s17 = smov 24   ;;  %s2639_s0 = smov 64  }
  0x1e   : > { %v955_v9 = vpack.c.bf16 %v952_v3, %v952_v3  ;;  %v956_v10 = vpack.c.bf16 %v953_v4, %v953_v4  ;;  %v957_v11 = vpack.c.bf16 %v954_v5, %v954_v5  ;;  %v479_v12 = vld [vmem:[%s2129_s30 + $0x28] sm:$0xff]  ;;  %v474_v13 = vld [vmem:[%s2129_s30] sm:$0xff]  ;;  %v480_v19 = vld [vmem:[%s2129_s30 + $0x30] sm:$0xff]  ;;  %s472_s23 = scalar_lea.vmem %s2642_s2, %s2122_s20  ;;  %s457_s20 = sand.u32 1, %s1984_s26  }
  0x1f   : > { %v475_v14 = vld [vmem:[%s2129_s30 + $0x8] sm:$0xff]  ;;  %v524_v15 = vunpack.c.l.b16 %v492_v6  ;;  %v525_v16 = vunpack.c.l.b16 %v493_v7  ;;  %v495_v17 = vpack.c.bf16 %v479_v12, %v479_v12  ;;  %v526_v18 = vunpack.c.l.b16 %v494_v8  ;;  %v481_v24 = vld [vmem:[%s2129_s30 + $0x38] sm:$0xff]  ;;  %v482_v44 = vld [vmem:[%s2129_s30 + $0x40] sm:$0xff]  ;;  %s1857_s24 = smul.u32 24, %s457_s20 }
  0x20   : > { %v961_v20 = vunpack.c.l.b16 %v955_v9  ;;  %v962_v21 = vunpack.c.l.b16 %v956_v10  ;;  %v963_v22 = vunpack.c.l.b16 %v957_v11  ;;  %v490_v23 = vpack.c.bf16 %v474_v13, %v474_v13  ;;  %v483_v45 = vld [vmem:[%s2129_s30 + $0x48] sm:$0xff]  ;;  %v484_v60 = vld [vmem:[%s2129_s30 + $0x50] sm:$0xff]  ;;  %v485_v61 = vld [vmem:[%s2129_s30 + $0x58] sm:$0xff] }
  0x21   : > { %v2142_v25 = vpack.c.b16 %v525_v16, %v524_v15  ;;  %v527_v26 = vunpack.c.l.b16 %v495_v17  ;;  %v491_v27 = vpack.c.bf16 %v475_v14, %v475_v14  ;;  %v496_v31 = vpack.c.bf16 %v480_v19, %v480_v19  ;;  %v1842_v3 = vld [vmem:[%s2613_s3 + $0x28] sm:$0xff]  ;;  %v1022_v8 = vld [vmem:[%s2617_s7 + $0x20] sm:$0xf]  ;;  %v1840_v19 = vld [vmem:[%s2613_s3 + $0x18] sm:$0xff]  ;;  %s459_s16 = scalar_lea.vmem [#allocation2], %s1857_s24 }
  0x22   : > { %v2144_v28 = vpack.c.b16 %v962_v21, %v961_v20  ;;  %v2146_v29 = vpack.c.b16 %v963_v22, %v963_v22  ;;  %v522_v30 = vunpack.c.l.b16 %v490_v23  ;;  %v497_v35 = vpack.c.bf16 %v481_v24, %v481_v24  ;;  %788 = vmatpush.bf16.msra.mxu0 %v1842_v3  ;;  %v1841_v9 = vld [vmem:[%s2613_s3 + $0x20] sm:$0xff] }
  0x23   : > { %v558_v32 = vshll.u32 %v2142_v25, 16  ;;  %v2149_v33 = vpack.c.b16 %v527_v26, %v526_v18  ;;  %v523_v34 = vunpack.c.l.b16 %v491_v27  ;;  %v555_v43 = vshrl.u32 %v2142_v25, 16  ;;  %v486_v17 = vld [vmem:[%s2129_s30 + $0x60] sm:$0xff]  ;;  %v487_v18 = vld [vmem:[%s2129_s30 + $0x68] sm:$0xff] }
  0x24   : > { %993 = vrot.lane.b32.xlu0 %v2144_v28, %s1994_s17  ;;  %v970_v36 = vshll.u32 %v2144_v28, 16  ;;  %995 = vrot.lane.b32.xlu1 %v2146_v29, %s1994_s17  ;;  %v967_v37 = vshrl.u32 %v2144_v28, 16  ;;  %v977_v38 = vshll.u32 %v2146_v29, 16  ;;  %v974_v39 = vshrl.u32 %v2146_v29, 16  ;;  %s1950_s17 = scalar_lea.hbm %s2623_s13, 48 }
  0x25   : > { %v2157_v40 = vpack.c.b16 %v523_v34, %v522_v30  ;;  %v566_v47 = vshll.u32 %v2149_v33, 16  ;;  %v617_v48 = vrot.slane %v558_v32, 1  ;;  %v528_v53 = vunpack.c.l.b16 %v496_v31  ;;  %v1839_v34 = vld [vmem:[%s2613_s3 + $0x10] sm:$0xff] }
  0x26   : > { %v983_v41 = vrot.slane %v970_v36, 1  ;;  %v985_v42 = vrot.slane %v977_v38, 1  ;;  %v529_v54 = vunpack.c.l.b16 %v497_v35  ;;  %v498_v56 = vpack.c.bf16 %v482_v44, %v482_v44  ;;  %789 = vmatpush.bf16.msra.mxu0 %v1841_v9 }
  0x27   : > { %642 = vrot.lane.b32.xlu2 %v2157_v40, %s2624_s21  ;;  %v551_v49 = vshll.u32 %v2157_v40, 16  ;;  %v548_v50 = vshrl.u32 %v2157_v40, 16  ;;  %v499_v57 = vpack.c.bf16 %v483_v45, %v483_v45  ;;  %v619_v63 = vor.u32 %v617_v48, %v555_v43  ;;  %s2626_s21 = smov 64  }
  0x28   : > { %v984_v51 = vor.u32 %v983_v41, %v967_v37  ;;  %v987_v52 = vor.u32 %v985_v42, %v974_v39  ;;  %v620_v0 = vrot.slane %v566_v47, 1  ;;  %v2196_v1 = vpack.c.b16 %v529_v54, %v528_v53 }
  0x29   : > { %v615_v55 = vrot.slane %v551_v49, 1  ;;  %v530_v2 = vunpack.c.l.b16 %v498_v56  ;;  %v531_v5 = vunpack.c.l.b16 %v499_v57  ;;  %v500_v6 = vpack.c.bf16 %v484_v60, %v484_v60 }
  0x2a   : > { %v986_v58 = vsel %vm614_vm2, %v984_v51, %v985_v42  ;;  %v992_v59 = vsel %vm2168_vm3, %v987_v52, 0  ;;  %v501_v7 = vpack.c.bf16 %v485_v61, %v485_v61  ;;  %v621_v10 = vsel %vm614_vm2, %v619_v63, %v620_v0  ;;  %790 = vmatpush.bf16.msra.mxu0 %v1840_v19  ;;  %v1848_v63 = vld [vmem:[%s2617_s7 + $0x18] sm:$0xff]  ;;  %v1845_v19 = vld [vmem:[%s2617_s7] sm:$0xff] }
  0x2b   : > { %v616_v62 = vor.u32 %v615_v55, %v548_v50  ;;  %v563_v11 = vshrl.u32 %v2149_v33, 16  ;;  %v1044_v12 = vunpack.c.l.b16 %v1022_v8  ;;  %v574_v13 = vshll.u32 %v2196_v1, 16 }
  0x2c   : > { %998 = vrot.lane.b32.xlu0 %v986_v58, %s1996_s22  ;;  %1000 = vrot.lane.b32.xlu1 %v992_v59, %s1996_s22  ;;  %v2212_v14 = vpack.c.b16 %v531_v5, %v530_v2  ;;  %v532_v15 = vunpack.c.l.b16 %v500_v6  ;;  %v533_v16 = vunpack.c.l.b16 %v501_v7  ;;  %v571_v22 = vshrl.u32 %v2196_v1, 16  ;;  %v488_v2 = vld [vmem:[%s2129_s30 + $0x70] sm:$0xff]  ;;  %v1837_v7 = vld [vmem:[%s2613_s3] sm:$0xff] }
  0x2d   : > { %v618_v4 = vsel %vm614_vm2, %v616_v62, %v617_v48  ;;  %v1049_v20 = vpack.c.b16 %v1044_v12, %v1044_v12  ;;  %v622_v21 = vor.u32 %v620_v0, %v563_v11  ;;  %v502_v23 = vpack.c.bf16 %v486_v17, %v486_v17  ;;  %v1838_v0 = vld [vmem:[%s2613_s3 + $0x8] sm:$0xff] }
  0x2e   : > { %v623_v26 = vrot.slane %v574_v13, 1  ;;  %v582_v27 = vshll.u32 %v2212_v14, 16  ;;  %v2229_v30 = vpack.c.b16 %v533_v16, %v532_v15  ;;  %v503_v31 = vpack.c.bf16 %v487_v18, %v487_v18  ;;  %791 = vmatpush.bf16.msra.mxu0 %v1839_v34  ;;  %v1846_v17 = vld [vmem:[%s2617_s7 + $0x8] sm:$0xff] }
  0x2f   : > { %659 = vrot.lane.b32.xlu2 %v618_v4, %s2626_s21  ;;  %v1061_v24 = vsel %vm989_vm0, %v1049_v20, 0  ;;  %v579_v35 = vshrl.u32 %v2212_v14, 16  ;;  %v534_v42 = vunpack.c.l.b16 %v502_v23  ;;  %v550_v62 = vrot.slane %v548_v50, 7  ;;  %v489_v4 = vld [vmem:[%s2129_s30 + $0x78] sm:$0xff]  ;;  %v1847_v50 = vld [vmem:[%s2617_s7 + $0x10] sm:$0xff]  ;;  %s1619_s30 = sshll.u32 %s459_s16, 4  ;;  %s1620_s30 = int_to_ptr.vmem [resolvable:$true] %s1619_s30 }
  0x30   : > { %1066 = vmatpush.bf16.msra.mxu2 %v1061_v24  ;;  %v625_v41 = vor.u32 %v623_v26, %v571_v22  ;;  %v624_v44 = vsel %vm614_vm2, %v622_v21, %v623_v26  ;;  %v590_v45 = vshll.u32 %v2229_v30, 16  ;;  %v626_v48 = vrot.slane %v582_v27, 1 }
  0x31   : > { %v535_v51 = vunpack.c.l.b16 %v503_v31  ;;  %v587_v57 = vshrl.u32 %v2229_v30, 16  ;;  %v553_v3 = vor.u32 %v551_v49, %v550_v62  ;;  %v504_v5 = vpack.c.bf16 %v488_v2, %v488_v2 }
  0x32   : > { %v627_v52 = vsel %vm614_vm2, %v625_v41, %v626_v48  ;;  %v628_v53 = vor.u32 %v626_v48, %v579_v35  ;;  %v629_v54 = vrot.slane %v590_v45, 1  ;;  %792 = vmatpush.bf16.msra.mxu0 %v1838_v0  ;;  %v505_v6 = vpack.c.bf16 %v489_v4, %v489_v4 }
  0x33   : > { %v2251_v55 = vpack.c.b16 %v535_v51, %v534_v42  ;;  %v536_v8 = vunpack.c.l.b16 %v504_v5  ;;  %v557_v23 = vrot.slane %v555_v43, 7  ;;  %v613_v31 = vsel %vm2314_vm8, 0, %v553_v3 }
  0x34   : > { %644 = vrot.lane.b32.xlu0 %v2142_v25, %s2638_s15  ;;  %661 = vrot.lane.b32.xlu1 %v621_v10, %s2626_s21  ;;  %v630_v56 = vsel %vm614_vm2, %v628_v53, %v629_v54  ;;  %v631_v59 = vor.u32 %v629_v54, %v587_v57  ;;  %v537_v9 = vunpack.c.l.b16 %v505_v6  ;;  %v565_v48 = vrot.slane %v563_v11, 7 }
  0x35   : > { %v598_v58 = vshll.u32 %v2251_v55, 16  ;;  %1067 = vmatpush.bf16.msra.mxu2 %v1848_v63  ;;  %v595_v18 = vshrl.u32 %v2251_v55, 16  ;;  %v560_v34 = vor.u32 %v558_v32, %v557_v23  ;;  %v969_v32 = vrot.slane %v967_v37, 7 }
  0x36   : > { %v2288_v10 = vpack.c.b16 %v537_v9, %v536_v8  ;;  %793 = vmatpush.bf16.msra.mxu0 %v1837_v7  ;;  %v568_v51 = vor.u32 %v566_v47, %v565_v48  ;;  %v976_v28 = vrot.slane %v974_v39, 7  ;;  %v589_v5 = vrot.slane %v587_v57, 7 }
  0x37   : > { %646 = vrot.lane.b32.xlu2 %v2149_v33, %s2638_s15  ;;  %v632_v60 = vrot.slane %v598_v58, 1  ;;  %v561_v41 = vsel %vm546_vm6, %v550_v62, %v560_v34  ;;  %v597_v9 = vrot.slane %v595_v18, 7  ;;  %v1844_v34 = vld [vmem:[%s2615_s5 + $0x8] sm:$0xff] }
  0x38   : > { %v603_v40 = vshrl.u32 %v2288_v10, 16  ;;  %v606_v49 = vshll.u32 %v2288_v10, 16  ;;  %v569_v25 = vsel %vm546_vm6, %v557_v23, %v568_v51  ;;  %909 = vmatpush.bf16.msra.mxu1 %v1844_v34  ;;  %v2403_v51 = vld [vmem:[%s2614_s4] ss:$0 sm:$0xff] }
  0x39   : > { %v633_v61 = vsel %vm614_vm2, %v631_v59, %v632_v60  ;;  %1068 = vmatpush.bf16.msra.mxu2 %v1847_v50  ;;  %v634_v20 = vor.u32 %v632_v60, %v595_v18  ;;  %v600_v57 = vor.u32 %v598_v58, %v597_v9 }
  0x3a   : > { %v635_v12 = vrot.slane %v606_v49, 1 }
  0x3c   : > { %663 = vrot.lane.b32.xlu0 %v624_v44, %s2626_s21  ;;  %648 = vrot.lane.b32.xlu1 %v2196_v1, %s2638_s15  ;;  %v637_v15 = vor.u32 %v635_v12, %v603_v40  ;;  %v636_v21 = vsel %vm614_vm2, %v634_v20, %v635_v12  ;;  %v979_v1 = vor.u32 %v977_v38, %v976_v28 }
  0x3d   : > { %1069 = vmatpush.bf16.msra.mxu2 %v1846_v17  ;;  %v605_v17 = vrot.slane %v603_v40, 7 }
  0x3e   : > { %v641_v16 = vsel %vm640_vm5, %v637_v15, 0  ;;  %v980_v0 = vsel %vm546_vm6, %v969_v32, %v979_v1  ;;  %v601_v15 = vsel %vm546_vm6, %v589_v5, %v600_v57 }
  0x3f   : > { %665 = vrot.lane.b32.xlu2 %v627_v52, %s2626_s21  ;;  %v573_v52 = vrot.slane %v571_v22, 7  ;;  %v608_v18 = vor.u32 %v606_v49, %v605_v17  ;;  %v1843_v49 = vld [vmem:[%s2615_s5] sm:$0xff] }
  0x40   : > { %910 = vmatpush.bf16.msra.mxu1 %v1843_v49 }
  0x41   : > { %1070 = vmatpush.bf16.msra.mxu2 %v1845_v19  ;;  %v576_v59 = vor.u32 %v574_v13, %v573_v52  ;;  %v609_v20 = vsel %vm546_vm6, %v597_v9, %v608_v18 }
  0x43   : > { %v577_v47 = vsel %vm546_vm6, %v565_v48, %v576_v59  ;;  %v1908_v59 = vld [vmem:[%s2618_s8] ss:$0 sm:$0xff] }
  0x44   : > { %650 = vrot.lane.b32.xlu0 %v2212_v14, %s2638_s15  ;;  %667 = vrot.lane.b32.xlu1 %v630_v56, %s2626_s21  ;;  %v972_v56 = vor.u32 %v970_v36, %v969_v32  ;;  %v581_v36 = vrot.slane %v579_v35, 7  ;;  %v592_v14 = vor.u32 %v590_v45, %v589_v5 }
  0x46   : > { %v982_v33 = vsel %vm2314_vm8, 0, %v972_v56  ;;  %v584_v2 = vor.u32 %v582_v27, %v581_v36  ;;  %v593_v27 = vsel %vm546_vm6, %v581_v36, %v592_v14 }
  0x47   : > { %652 = vrot.lane.b32.xlu2 %v2229_v30, %s2638_s15 }
  0x48   : > { %v585_v39 = vsel %vm546_vm6, %v573_v52, %v584_v2 }
  0x4c   : > { %669 = vrot.lane.b32.xlu0 %v633_v61, %s2626_s21  ;;  %654 = vrot.lane.b32.xlu1 %v2251_v55, %s2638_s15 }
  0x4f   : > { %671 = vrot.lane.b32.xlu2 %v636_v21, %s2639_s0 }
  0x54   : > { %656 = vrot.lane.b32.xlu0 %v2288_v10, %s2638_s15  ;;  %673 = vrot.lane.b32.xlu1 %v641_v16, %s2639_s0 }
  0x81   : > { %v643_v26 = vpop.permute.xlu2 %642 }
  0x82   : > { %v678_v42 = vsel %vm675_vm9, %v613_v31, %v643_v26 }
  0x89   : > { %v660_v43 = vpop.permute.xlu2 %659 }
  0x8a   : > { %v702_v44 = vsel %vm700_vm10, %v678_v42, %v660_v43 }
  0x8b   : > { %1736 = vmatmul.msk.bf16.vlgmr.msra.gmra.mxu0 %vm769_vm11, %v702_v44 }
  0x91   : > { %v647_v38 = vpop.permute.xlu2 %646 }
  0x92   : > { %v684_v3 = vsel %vm675_vm9, %v569_v25, %v647_v38 }
  0x96   : > { %v994_v53 = vpop.permute.xlu0 %993  ;;  %v996_v54 = vpop.permute.xlu1 %995 }
  0x97   : > { %v1005_v37 = vsel %vm1002_vm12, %v982_v33, %v994_v53  ;;  %v1008_v35 = vsel %vm1002_vm12, %v980_v0, %v996_v54 }
  0x99   : > { %v666_v8 = vpop.permute.xlu2 %665 }
  0x9e   : > { %v999_v11 = vpop.permute.xlu0 %998  ;;  %v1001_v22 = vpop.permute.xlu1 %1000 }
  0x9f   : > { %v1011_v60 = vsel %vm1009_vm13, %v1005_v37, %v999_v11  ;;  %v1013_v29 = vsel %vm1009_vm13, %v1008_v35, %v1001_v22 }
  0xa0   : > { %1776 = vmatmul.msk.bf16.vlgmr.msra.gmra.mxu2 %vm1054_vm14, %v1011_v60 }
  0xa1   : > { %v653_v55 = vpop.permute.xlu2 %652 }
  0xa2   : > { %v693_v58 = vsel %vm675_vm9, %v593_v27, %v653_v55 }
  0xa6   : > { %v645_v13 = vpop.permute.xlu0 %644  ;;  %v662_v61 = vpop.permute.xlu1 %661 }
  0xa7   : > { %v681_v62 = vsel %vm675_vm9, %v561_v41, %v645_v13 }
  0xa8   : > { %v704_v63 = vsel %vm700_vm10, %v681_v62, %v662_v61 }
  0xa9   : > { %1737 = vmatmul.msk.bf16.gmra.mxu0 %vm769_vm11, %v704_v63  ;;  %v672_v31 = vpop.permute.xlu2 %671 }
  0xae   : > { %v664_v4 = vpop.permute.xlu0 %663  ;;  %v649_v50 = vpop.permute.xlu1 %648 }
  0xaf   : > { %v706_v6 = vsel %vm700_vm10, %v684_v3, %v664_v4  ;;  %v687_v7 = vsel %vm675_vm9, %v577_v47, %v649_v50 }
  0xb0   : > { %1777 = vmatmul.msk.bf16.gmra.mxu2 %vm1054_vm14, %v1013_v29  ;;  %v708_v12 = vsel %vm700_vm10, %v687_v7, %v666_v8 }
  0xb6   : > { %v651_v30 = vpop.permute.xlu0 %650  ;;  %v668_v16 = vpop.permute.xlu1 %667 }
  0xb7   : > { %v690_v45 = vsel %vm675_vm9, %v585_v39, %v651_v30 }
  0xb8   : > { %v710_v19 = vsel %vm700_vm10, %v690_v45, %v668_v16 }
  0xb9   : > { %1738 = vmatmul.msk.bf16.gmra.mxu0 %vm769_vm11, %v706_v6 }
  0xbe   : > { %v670_v21 = vpop.permute.xlu0 %669  ;;  %v655_v26 = vpop.permute.xlu1 %654 }
  0xbf   : > { %v712_v23 = vsel %vm700_vm10, %v693_v58, %v670_v21  ;;  %v696_v40 = vsel %vm675_vm9, %v601_v15, %v655_v26 }
  0xc0   : > { %v714_v10 = vsel %vm700_vm10, %v696_v40, %v672_v31 }
  0xc6   : > { %v657_v41 = vpop.permute.xlu0 %656  ;;  %v674_v43 = vpop.permute.xlu1 %673 }
  0xc7   : > { %v699_v42 = vsel %vm675_vm9, %v609_v20, %v657_v41 }
  0xc8   : > { %v716_v44 = vsel %vm700_vm10, %v699_v42, %v674_v43 }
  0xc9   : > { %1739 = vmatmul.msk.bf16.gmra.mxu0 %vm769_vm11, %v708_v12 }
  0xd9   : > { %1740 = vmatmul.msk.bf16.gmra.mxu0 %vm769_vm11, %v710_v19 }
  0xe9   : > { %1741 = vmatmul.msk.bf16.gmra.mxu0 %vm769_vm11, %v712_v23 }
  0xf9   : > { %1742 = vmatmul.msk.bf16.gmra.mxu0 %vm769_vm11, %v714_v10 }
 0x108   : > { %v795_v48 = vpop.f32.mrf.mxu0 }
 0x109   : > { %1743 = vmatmul.msk.bf16.gmra.mxu0 %vm769_vm11, %v716_v44  ;;  %v796_v25 = vadd.f32 %v2403_v51, %v795_v48 }
 0x10b   : > { %v835_v52 = vmax.f32 %v796_v25, 0.0 }
 0x110   : > { %v797_v32 = vpop.f32.mrf.mxu0 }
 0x111   : > { %v798_v53 = vadd.f32 %v2403_v51, %v797_v32 }
 0x113   : > { %v836_v54 = vmax.f32 %v798_v53, 0.0 }
 0x115   : > { %v851_v56 = vpack.c.bf16 %v836_v54, %v835_v52 }
 0x117   : > { %1752 = vmatmul.msk.bf16.vlgmr.msra.gmra.mxu1 %vm675_vm9, %v851_v56 }
 0x123   : > { %v1072_v33 = vpop.f32.mrf.mxu2 }
 0x124   : > { %v1073_v47 = vadd.f32 %v1908_v59, %v1072_v33 }
 0x126   : > { %v800_v37 = vpop.f32.mrf.mxu0  ;;  %v1081_v11 = vmax.f32 %v1073_v47, 0.0 }
 0x127   : > { %v801_v22 = vadd.f32 %v2403_v51, %v800_v37 }
 0x128   : > { %v1100_v36 = vpack.c.bf16 %v1081_v11, %v1081_v11 }
 0x129   : > { %v837_v61 = vmax.f32 %v801_v22, 0.0 }
 0x12a   : > { %v1106_v2 = vunpack.c.l.b16 %v1100_v36 }
 0x12b   : > { %v1074_v60 = vpop.f32.mrf.mxu2 }
 0x12c   : > { %v1075_v28 = vadd.f32 %v1908_v59, %v1074_v60 }
 0x12e   : > { %v1082_v1 = vmax.f32 %v1075_v28, 0.0  ;;  %v802_v13 = vpop.f32.mrf.mxu0 }
 0x12f   : > { %v803_v62 = vadd.f32 %v2403_v51, %v802_v13  ;;  %v1854_v13 = vld [vmem:[%s2619_s9 + $0x28] sm:$0xff] }
 0x130   : > { %v1101_v63 = vpack.c.bf16 %v1082_v1, %v1082_v1  ;;  %1212 = vmatpush.bf16.msra.mxu3 %v1854_v13 }
 0x131   : > { %v838_v0 = vmax.f32 %v803_v62, 0.0 }
 0x132   : > { %v1107_v39 = vunpack.c.l.b16 %v1101_v63  ;;  %v1853_v63 = vld [vmem:[%s2619_s9 + $0x20] sm:$0xff] }
 0x133   : > { %v852_v35 = vpack.c.bf16 %v838_v0, %v837_v61  ;;  %v1077_v29 = vpop.f32.mrf.mxu2 }
 0x134   : > { %v1078_v38 = vadd.f32 %v1908_v59, %v1077_v29  ;;  %v1109_v3 = vpack.c.b16 %v1107_v39, %v1106_v2  ;;  %1213 = vmatpush.bf16.msra.mxu3 %v1853_v63  ;;  %v1852_v39 = vld [vmem:[%s2619_s9 + $0x18] sm:$0xff]  ;;  %v1851_v29 = vld [vmem:[%s2619_s9 + $0x10] sm:$0xff] }
 0x135   : > { %1753 = vmatmul.msk.bf16.gmra.mxu1 %vm675_vm9, %v852_v35 }
 0x136   : > { %v1083_v4 = vmax.f32 %v1078_v38, 0.0  ;;  %1135 = vrot.lane.b32.xlu2 %v1109_v3, %s2638_s15  ;;  %v805_v5 = vpop.f32.mrf.mxu0  ;;  %v1112_v6 = vshrl.u32 %v1109_v3, 16  ;;  %v1115_v27 = vshll.u32 %v1109_v3, 16  ;;  %v1850_v3 = vld [vmem:[%s2619_s9 + $0x8] sm:$0xff] }
 0x137   : > { %v806_v9 = vadd.f32 %v2403_v51, %v805_v5 }
 0x138   : > { %v1102_v14 = vpack.c.bf16 %v1083_v4, %v1083_v4  ;;  %v1114_v50 = vrot.slane %v1112_v6, 7  ;;  %v1128_v15 = vrot.slane %v1115_v27, 1  ;;  %1214 = vmatpush.bf16.msra.mxu3 %v1852_v39 }
 0x139   : > { %v839_v17 = vmax.f32 %v806_v9, 0.0 }
 0x13a   : > { %v1108_v7 = vunpack.c.l.b16 %v1102_v14  ;;  %v2415_v8 = vor.u32 %v1115_v27, %v1114_v50  ;;  %v1129_v18 = vor.u32 %v1128_v15, %v1112_v6  ;;  %v1849_v27 = vld [vmem:[%s2619_s9] sm:$0xff] }
 0x13b   : > { %v1079_v12 = vpop.f32.mrf.mxu2 }
 0x13c   : > { %v1110_v57 = vpack.c.b16 %v1108_v7, %v1108_v7  ;;  %1215 = vmatpush.bf16.msra.mxu3 %v1851_v29  ;;  %v1127_v15 = vsel %vm2314_vm8, 0, %v2415_v8 }
 0x13e   : > { %v1122_v30 = vshll.u32 %v1110_v57, 16  ;;  %1137 = vrot.lane.b32.xlu1 %v1110_v57, %s2638_s15  ;;  %v807_v45 = vpop.f32.mrf.mxu0  ;;  %v1119_v16 = vshrl.u32 %v1110_v57, 16  ;;  %s1859_s15 = smul.u32 24, %s2093_s29 }
 0x13f   : > { %v808_v19 = vadd.f32 %v2403_v51, %v807_v45 }
 0x140   : > { %v1130_v20 = vrot.slane %v1122_v30, 1  ;;  %v1121_v55 = vrot.slane %v1119_v16, 7  ;;  %1216 = vmatpush.bf16.msra.mxu3 %v1850_v3  ;;  %s1618_s22 = scalar_lea.hbm %s2623_s13, %s1859_s15 }
 0x141   : > { %v840_v58 = vmax.f32 %v808_v19, 0.0  ;;  %s1621_s21 = sshll.u32 %s1618_s22, 4  ;;  %s1622_s21 = int_to_ptr.hbm [resolvable:$true] %s1621_s21 }
 0x142   : > { %v1131_v21 = vsel %vm614_vm2, %v1129_v18, %v1130_v20  ;;  %v1132_v23 = vor.u32 %v1130_v20, %v1119_v16  ;;  %v1124_v26 = vor.u32 %v1122_v30, %v1121_v55  ;;  %s1944_s24 = sshra.s32 %s1622_s21, 4  ;;  %s1945_s24 = int_to_ptr.hbm [resolvable:$true] %s1944_s24 }
 0x143   : > { %v853_v40 = vpack.c.bf16 %v840_v58, %v839_v17  ;;  %1140 = vrot.lane.b32.xlu0 %v1131_v21, %s2639_s0  ;;  %s1946_s29 = scalar_lea.hbm %s1945_s24, 24  ;;  %p1951_p0 = scmp.lt.s32.totalorder %s1945_s24, %s2623_s13 }
 0x144   : > { %v1134_v31 = vsel %vm2168_vm3, %v1132_v23, 0  ;;  %v2425_v34 = vsel %vm546_vm6, %v1114_v50, %v1124_v26  ;;  %1217 = vmatpush.bf16.msra.mxu3 %v1849_v27  ;;  %v1909_v23 = vld [vmem:[%s2616_s6] ss:$0 sm:$0xff]  ;;  %p1947_p11 = scmp.ne.s32.totalorder %s1945_s24, %s1946_s29  ;;  %p1952_p1 = scmp.lt.s32.totalorder %s1950_s17, %s1946_s29 }
 0x145   : > { %1142 = vrot.lane.b32.xlu2 %v1134_v31, %s2639_s0  ;;  %1754 = vmatmul.msk.bf16.gmra.mxu1 %vm675_vm9, %v853_v40 }
 0x146   : > { %v810_v10 = vpop.f32.mrf.mxu0  ;;  %p1948_p12 = pnand %p1947_p11, %p2110_p5  ;;  %p1953_p2 = por %p1952_p1, %p1951_p0 }
 0x147   : > { %v811_v49 = vadd.f32 %v2403_v51, %v810_v10 }
 0x148   : > { %p1949_p13 = pneg %p1948_p12 }
 0x149   : > { %v841_v42 = vmax.f32 %v811_v49, 0.0 }
 0x14a   : > { %p1954_p3 = pnand %p1953_p2, %p1949_p13 }
 0x14e   : > { %v812_v41 = vpop.f32.mrf.mxu0 }
 0x14f   : > { %v813_v43 = vadd.f32 %v2403_v51, %v812_v41 }
 0x151   : > { %v842_v44 = vmax.f32 %v813_v43, 0.0 }
 0x153   : > { %v854_v48 = vpack.c.bf16 %v842_v44, %v841_v42 }
 0x155   : > { %1755 = vmatmul.msk.bf16.gmra.mxu1 %vm675_vm9, %v854_v48  ;;  %v1856_v48 = vld [vmem:[%s2621_s11 + $0x8] sm:$0xff] }
 0x156   : > { %v815_v46 = vpop.f32.mrf.mxu0  ;;  %1265 = vmatpush.bf16.msrb.mxu2 %v1856_v48 }
 0x157   : > { %v816_v25 = vadd.f32 %v2403_v51, %v815_v46 }
 0x159   : > { %v843_v52 = vmax.f32 %v816_v25, 0.0 }
 0x15e   : > { %v817_v32 = vpop.f32.mrf.mxu0 }
 0x15f   : > { %v818_v53 = vadd.f32 %v2403_v51, %v817_v32  ;;  %v1855_v32 = vld [vmem:[%s2621_s11] sm:$0xff] }
 0x160   : > { %1266 = vmatpush.bf16.msrb.mxu2 %v1855_v32 }
 0x161   : > { %v844_v54 = vmax.f32 %v818_v53, 0.0 }
 0x163   : > { %v855_v56 = vpack.c.bf16 %v844_v54, %v843_v52 }
 0x165   : > { %1756 = vmatmul.msk.bf16.gmra.mxu1 %vm675_vm9, %v855_v56 }
 0x166   : > { %v820_v59 = vpop.f32.mrf.mxu0 }
 0x167   : > { %v821_v33 = vadd.f32 %v2403_v51, %v820_v59 }
 0x169   : > { %v845_v37 = vmax.f32 %v821_v33, 0.0 }
 0x16e   : > { %v822_v47 = vpop.f32.mrf.mxu0 }
 0x16f   : > { %v823_v11 = vadd.f32 %v2403_v51, %v822_v47 }
 0x171   : > { %v846_v22 = vmax.f32 %v823_v11, 0.0 }
 0x173   : > { %v856_v60 = vpack.c.bf16 %v846_v22, %v845_v37 }
 0x175   : > { %1757 = vmatmul.msk.bf16.gmra.mxu1 %vm675_vm9, %v856_v60 }
 0x176   : > { %v825_v28 = vpop.f32.mrf.mxu0 }
 0x177   : > { %v826_v36 = vadd.f32 %v2403_v51, %v825_v28 }
 0x179   : > { %v847_v61 = vmax.f32 %v826_v36, 0.0 }
 0x17e   : > { %v827_v1 = vpop.f32.mrf.mxu0 }
 0x17f   : > { %v828_v62 = vadd.f32 %v2403_v51, %v827_v1 }
 0x181   : > { %v848_v0 = vmax.f32 %v828_v62, 0.0 }
 0x183   : > { %v857_v2 = vpack.c.bf16 %v848_v0, %v847_v61 }
 0x185   : > { %1758 = vmatmul.msk.bf16.gmra.mxu1 %vm675_vm9, %v857_v2 }
 0x186   : > { %v830_v35 = vpop.f32.mrf.mxu0 }
 0x187   : > { %v831_v38 = vadd.f32 %v2403_v51, %v830_v35 }
 0x189   : > { %v849_v5 = vmax.f32 %v831_v38, 0.0 }
 0x18e   : > { %v832_v4 = vpop.f32.mrf.mxu0 }
 0x18f   : > { %v833_v6 = vadd.f32 %v2403_v51, %v832_v4 }
 0x190   : > { %v1136_v12 = vpop.permute.xlu2 %1135 }
 0x191   : > { %v850_v14 = vmax.f32 %v833_v6, 0.0  ;;  %v1146_v51 = vsel %vm675_vm9, %v1127_v15, %v1136_v12 }
 0x193   : > { %v858_v50 = vpack.c.bf16 %v850_v14, %v849_v5 }
 0x194   : > { %v912_v7 = vpop.f32.mrf.mxu1 }
 0x195   : > { %1759 = vmatmul.msk.bf16.gmra.mxu1 %vm675_vm9, %v858_v50  ;;  %v913_v26 = vadd.f32 %v1909_v23, %v912_v7 }
 0x197   : > { %v2475_v10 = vpack.c.bf16 %v913_v26, %v913_v26 }
 0x19c   : > { %v914_v9 = vpop.f32.mrf.mxu1 }
 0x19d   : > { %v915_v40 = vadd.f32 %v1909_v23, %v914_v9 }
 0x19f   : > { %v1143_v20 = vpop.permute.xlu2 %1142  ;;  %v2477_v49 = vpack.c.bf16 %v915_v40, %v915_v40 }
 0x1a1   : > { %v1340_v41 = vunpack.c.l.b16 %v2477_v49 }
 0x1b0   : > { %v1138_v17 = vpop.permute.xlu1 %1137 }
 0x1b1   : > { %v1149_v18 = vsel %vm675_vm9, %v2425_v34, %v1138_v17  ;;  %v1339_v34 = vunpack.c.l.b16 %v2475_v10 }
 0x1b2   : > { %v917_v57 = vpop.f32.mrf.mxu1  ;;  %v1153_v55 = vsel %vm700_vm10, %v1149_v18, %v1143_v20 }
 0x1b3   : > { %v2481_v43 = vpack.c.b16 %v1340_v41, %v1339_v34  ;;  %v918_v46 = vadd.f32 %v1909_v23, %v917_v57 }
 0x1b5   : > { %v1141_v30 = vpop.permute.xlu0 %1140  ;;  %v2489_v53 = vpack.c.bf16 %v918_v46, %v918_v46 }
 0x1b6   : > { %v1151_v45 = vsel %vm700_vm10, %v1146_v51, %v1141_v30 }
 0x1b7   : > { %1802 = vmatmul.msk.bf16.vlgmr.msra.gmra.mxu3 %vm769_vm11, %v1151_v45  ;;  %v1341_v56 = vunpack.c.l.b16 %v2489_v53 }
 0x1ba   : > { %v919_v16 = vpop.f32.mrf.mxu1 }
 0x1bb   : > { %v920_v25 = vadd.f32 %v1909_v23, %v919_v16 }
 0x1bd   : > { %v2491_v54 = vpack.c.bf16 %v920_v25, %v920_v25 }
 0x1bf   : > { %v1342_v59 = vunpack.c.l.b16 %v2491_v54 }
 0x1c1   : > { %v2495_v47 = vpack.c.b16 %v1342_v59, %v1341_v56 }
 0x1c2   : > { %v922_v19 = vpop.f32.mrf.mxu1 }
 0x1c3   : > { %v923_v22 = vadd.f32 %v1909_v23, %v922_v19 }
 0x1c5   : > { %v2501_v13 = vpack.c.bf16 %v923_v22, %v923_v22 }
 0x1c7   : > { %1803 = vmatmul.msk.bf16.gmra.mxu3 %vm769_vm11, %v1153_v55  ;;  %v1343_v35 = vunpack.c.l.b16 %v2501_v13 }
 0x1ca   : > { %v924_v24 = vpop.f32.mrf.mxu1 }
 0x1cb   : > { %v925_v60 = vadd.f32 %v1909_v23, %v924_v24 }
 0x1cd   : > { %v2503_v61 = vpack.c.bf16 %v925_v60, %v925_v60 }
 0x1cf   : > { %v1344_v29 = vunpack.c.l.b16 %v2503_v61 }
 0x1d1   : > { %v2511_v7 = vpack.c.b16 %v1344_v29, %v1343_v35 }
 0x1d2   : > { %v927_v8 = vpop.f32.mrf.mxu1 }
 0x1d3   : > { %v928_v62 = vadd.f32 %v1909_v23, %v927_v8 }
 0x1d5   : > { %v2509_v38 = vpack.c.bf16 %v928_v62, %v928_v62 }
 0x1d7   : > { %v1345_v9 = vunpack.c.l.b16 %v2509_v38 }
 0x1da   : > { %v929_v58 = vpop.f32.mrf.mxu1 }
 0x1db   : > { %v930_v63 = vadd.f32 %v1909_v23, %v929_v58 }
 0x1dd   : > { %v1287_v4 = vpack.c.bf16 %v930_v63, %v930_v63 }
 0x1df   : > { %v1346_v57 = vunpack.c.l.b16 %v1287_v4  ;;  %v1306_v63 = vunpack.c.l.bf16 %v1287_v4  ;;  %v1304_v4 = vunpack.c.l.bf16 %v2503_v61 }
 0x1e1   : > { %v1358_v58 = vpack.c.b16 %v1346_v57, %v1345_v9  ;;  %v1302_v57 = vunpack.c.l.bf16 %v2491_v54  ;;  %v1299_v54 = vunpack.c.l.bf16 %v2475_v10 }
 0x1e2   : > { %v932_v21 = vpop.f32.mrf.mxu1 }
 0x1e3   : > { %v933_v37 = vadd.f32 %v1909_v23, %v932_v21  ;;  %v1379_v35 = vsel %vm675_vm9, %v1358_v58, 0 }
 0x1e5   : > { %v2497_v28 = vpack.c.bf16 %v933_v37, %v933_v37 }
 0x1e7   : > { %v1347_v0 = vunpack.c.l.b16 %v2497_v28  ;;  %v1307_v22 = vunpack.c.l.bf16 %v2497_v28 }
 0x1ea   : > { %v934_v31 = vpop.f32.mrf.mxu1 }
 0x1eb   : > { %v935_v11 = vadd.f32 %v1909_v23, %v934_v31 }
 0x1ed   : > { %v2499_v36 = vpack.c.bf16 %v935_v11, %v935_v11 }
 0x1ef   : > { %v1348_v2 = vunpack.c.l.b16 %v2499_v36  ;;  %v1308_v37 = vunpack.c.l.bf16 %v2499_v36  ;;  %v1910_v36 = vld [vmem:[%s2620_s10] ss:$0 sm:$0xff] }
 0x1f1   : > { %v1359_v14 = vpack.c.b16 %v1348_v2, %v1347_v0  ;;  %v1432_v60 = vmul.f32 %v1308_v37, %v1308_v37  ;;  %v1431_v0 = vmul.f32 %v1307_v22, %v1307_v22  ;;  %v1305_v2 = vunpack.c.l.bf16 %v2509_v38 }
 0x1f2   : > { %v937_v42 = vpop.f32.mrf.mxu1  ;;  %v1303_v38 = vunpack.c.l.bf16 %v2501_v13 }
 0x1f3   : > { %v938_v19 = vadd.f32 %v1909_v23, %v937_v42 }
 0x1f4   : > { %v1427_v61 = vmul.f32 %v1303_v38, %v1303_v38 }
 0x1f5   : > { %v1290_v31 = vpack.c.bf16 %v938_v19, %v938_v19 }
 0x1f7   : > { %v1309_v56 = vunpack.c.l.bf16 %v1290_v31 }
 0x1f9   : > { %v1433_v11 = vmul.f32 %v1309_v56, %v1309_v56 }
 0x1fa   : > { %v939_v44 = vpop.f32.mrf.mxu1 }
 0x1fb   : > { %v940_v18 = vadd.f32 %v1909_v23, %v939_v44 }
 0x1fd   : > { %v1291_v34 = vpack.c.bf16 %v940_v18, %v940_v18 }
 0x1ff   : > { %v1350_v42 = vunpack.c.l.b16 %v1291_v34  ;;  %v1310_v25 = vunpack.c.l.bf16 %v1291_v34 }
 0x201   : > { %v1434_v59 = vmul.f32 %v1310_v25, %v1310_v25 }
 0x202   : > { %v942_v52 = vpop.f32.mrf.mxu1 }
 0x203   : > { %v943_v3 = vadd.f32 %v1909_v23, %v942_v52 }
 0x205   : > { %v1292_v12 = vpack.c.bf16 %v943_v3, %v943_v3  ;;  %v1429_v3 = vmul.f32 %v1305_v2, %v1305_v2 }
 0x207   : > { %v1351_v20 = vunpack.c.l.b16 %v1292_v12  ;;  %v1311_v48 = vunpack.c.l.bf16 %v1292_v12  ;;  %v1376_v12 = vsel %vm675_vm9, %v2511_v7, 0  ;;  %v1300_v7 = vunpack.c.l.bf16 %v2477_v49  ;;  %v1911_v49 = vld [vmem:[%s2622_s12] ss:$0 sm:$0xff] }
 0x209   : > { %v1435_v32 = vmul.f32 %v1311_v48, %v1311_v48  ;;  %v1424_v18 = vmul.f32 %v1300_v7, %v1300_v7 }
 0x20a   : > { %v944_v33 = vpop.f32.mrf.mxu1 }
 0x20b   : > { %v945_v5 = vadd.f32 %v1909_v23, %v944_v33 }
 0x20d   : > { %v1293_v15 = vpack.c.bf16 %v945_v5, %v945_v5 }
 0x20f   : > { %v1352_v55 = vunpack.c.l.b16 %v1293_v15  ;;  %v1312_v21 = vunpack.c.l.bf16 %v1293_v15 }
 0x211   : > { %v1361_v41 = vpack.c.b16 %v1352_v55, %v1351_v20  ;;  %v1436_v46 = vmul.f32 %v1312_v21, %v1312_v21  ;;  %v1423_v20 = vmul.f32 %v1299_v54, %v1299_v54 }
 0x212   : > { %v947_v1 = vpop.f32.mrf.mxu1 }
 0x213   : > { %v948_v39 = vadd.f32 %v1909_v23, %v947_v1  ;;  %v1388_v44 = vsel %vm675_vm9, %v1361_v41, 0  ;;  %v1382_v1 = vsel %vm675_vm9, %v1359_v14, 0 }
 0x215   : > { %v1294_v6 = vpack.c.bf16 %v948_v39, %v948_v39  ;;  %v1430_v39 = vmul.f32 %v1306_v63, %v1306_v63 }
 0x217   : > { %v1353_v51 = vunpack.c.l.b16 %v1294_v6  ;;  %v1313_v45 = vunpack.c.l.bf16 %v1294_v6 }
 0x219   : > { %v1437_v26 = vmul.f32 %v1313_v45, %v1313_v45 }
 0x21a   : > { %v949_v27 = vpop.f32.mrf.mxu1 }
 0x21b   : > { %v950_v50 = vadd.f32 %v1909_v23, %v949_v27  ;;  %v1349_v23 = vunpack.c.l.b16 %v1290_v31 }
 0x21d   : > { %v1295_v30 = vpack.c.bf16 %v950_v50, %v950_v50  ;;  %v1360_v52 = vpack.c.b16 %v1350_v42, %v1349_v23  ;;  %v1428_v50 = vmul.f32 %v1304_v4, %v1304_v4 }
 0x21f   : > { %v1314_v16 = vunpack.c.l.bf16 %v1295_v30  ;;  %v1354_v17 = vunpack.c.l.b16 %v1295_v30  ;;  %v1385_v33 = vsel %vm675_vm9, %v1360_v52, 0  ;;  %v1426_v30 = vmul.f32 %v1302_v57, %v1302_v57 }
 0x221   : > { %v1438_v24 = vmul.f32 %v1314_v16, %v1314_v16  ;;  %v1362_v8 = vpack.c.b16 %v1354_v17, %v1353_v51  ;;  %v1301_v51 = vunpack.c.l.bf16 %v2489_v53  ;;  %v1373_v16 = vsel %vm675_vm9, %v2495_v47, 0 }
 0x222   : > { %v1370_v53 = vsel %vm675_vm9, %v2481_v43, 0  ;;  %v1998_v47 = vmov 1.0  }
 0x223   : > { %1816 = vmatpush.xpose.msk.msra.mxu2 %vm675_vm9, %v1438_v24  ;;  %v1391_v40 = vsel %vm675_vm9, %v1362_v8, 0  ;;  %v1425_v17 = vmul.f32 %v1301_v51, %v1301_v51 }
 0x224   : > { %1393 = vmatpush.bf16.xpose.msrb.mxu3 %v1391_v40 }
 0x227   : > { %1817 = vmatpush.xpose.msk.msra.mxu2 %vm675_vm9, %v1437_v26 }
 0x22b   : > { %1818 = vmatpush.xpose.msk.msra.mxu2 %vm675_vm9, %v1436_v46 }
 0x22c   : > { %1394 = vmatpush.bf16.xpose.msrb.mxu3 %v1388_v44 }
 0x22f   : > { %1819 = vmatpush.xpose.msk.msra.mxu2 %vm675_vm9, %v1435_v32 }
 0x233   : > { %1820 = vmatpush.xpose.msk.msra.mxu2 %vm675_vm9, %v1434_v59 }
 0x234   : > { %1395 = vmatpush.bf16.xpose.msrb.mxu3 %v1385_v33 }
 0x237   : > { %1821 = vmatpush.xpose.msk.msra.mxu2 %vm675_vm9, %v1433_v11 }
 0x23a   : > { %v1219_v62 = vpop.f32.mrf.mxu3 }
 0x23b   : > { %1822 = vmatpush.xpose.msk.msra.mxu2 %vm675_vm9, %v1432_v60  ;;  %v1220_v28 = vadd.f32 %v1910_v36, %v1219_v62 }
 0x23c   : > { %1396 = vmatpush.bf16.xpose.msrb.mxu3 %v1382_v1 }
 0x23d   : > { %v1228_v6 = vmax.f32 %v1220_v28, 0.0 }
 0x23f   : > { %1823 = vmatpush.xpose.msk.msra.mxu2 %vm675_vm9, %v1431_v0 }
 0x242   : > { %v1221_v29 = vpop.f32.mrf.mxu3 }
 0x243   : > { %v1222_v5 = vadd.f32 %v1910_v36, %v1221_v29  ;;  %1824 = vmatpush.xpose.msk.msra.mxu2 %vm675_vm9, %v1430_v39 }
 0x244   : > { %1397 = vmatpush.bf16.xpose.msrb.mxu3 %v1379_v35 }
 0x245   : > { %v1229_v14 = vmax.f32 %v1222_v5, 0.0 }
 0x247   : > { %v1231_v27 = vpack.c.bf16 %v1229_v14, %v1228_v6  ;;  %1825 = vmatpush.xpose.msk.msra.mxu2 %vm675_vm9, %v1429_v3  ;;  %v1562_v14 = vld [vmem:[%s472_s23] sm:$0x1]  ;;  %s1607_s23 = scalar_lea.sflag [#allocation3], %s457_s20 }
 0x248   : > { %vm1563_vm15 = vcmp.gt.f32.partialorder %v1562_v14, 0.0 }
 0x249   : > { %1812 = vmatmul.msk.bf16.vlgmr.msrb.gmra.mxu2 %vm675_vm9, %v1231_v27 }
 0x24a   : > { %v1224_v9 = vpop.f32.mrf.mxu3 }
 0x24b   : > { %1826 = vmatpush.xpose.msk.msra.mxu2 %vm675_vm9, %v1428_v50  ;;  %v1225_v15 = vadd.f32 %v1910_v36, %v1224_v9 }
 0x24c   : > { %1398 = vmatpush.bf16.xpose.msrb.mxu3 %v1376_v12 }
 0x24d   : > { %v1230_v45 = vmax.f32 %v1225_v15, 0.0  ;;  %v1999_v15 = vmov 0  }
 0x24e   : > { %v1564_v51 = vsel %vm1563_vm15, 1, %v1999_v15 }
 0x24f   : > { %1827 = vmatpush.xpose.msk.msra.mxu2 %vm675_vm9, %v1427_v61  ;;  %v1232_v19 = vpack.c.bf16 %v1230_v45, %v1230_v45  ;;  %v1565_v7 = vperm.slane %v1564_v51, 0 }
 0x251   : > { %vm2568_vm2 = vcmp.eq.s32.totalorder %v1565_v7, 1 }
 0x252   : > { %v1226_v13 = vpop.f32.mrf.mxu3 }
 0x253   : > { %1828 = vmatpush.xpose.msk.msra.mxu2 %vm675_vm9, %v1426_v30 }
 0x254   : > { %1399 = vmatpush.bf16.xpose.msrb.mxu3 %v1373_v16 }
 0x257   : > { %1829 = vmatpush.xpose.msk.msra.mxu2 %vm675_vm9, %v1425_v17 }
 0x259   : > { %1813 = vmatmul.msk.bf16.gmra.mxu2 %vm675_vm9, %v1232_v19 }
 0x25b   : > { %1830 = vmatpush.xpose.msk.msra.mxu2 %vm675_vm9, %v1424_v18 }
 0x25c   : > { %1400 = vmatpush.bf16.xpose.msrb.mxu3 %v1370_v53 }
 0x25f   : > { %1831 = vmatpush.xpose.msk.msra.mxu2 %vm675_vm9, %v1423_v20 }
 0x269   : > { %1832 = vmatmul.msk.f32.vlgmr.msra.gmra.mxu2 %vm675_vm9, %v1998_v47 }
 0x2cc   : > { %v1268_v10 = vpop.f32.mrf.mxu2 }
 0x2cd   : > { %v1269_v55 = vadd.f32 %v1911_v49, %v1268_v10 }
 0x2cf   : > { %v1277_v24 = vpack.c.bf16 %v1269_v55, %v1269_v55 }
 0x2d1   : > { %v1296_v8 = vunpack.c.l.bf16 %v1277_v24  ;;  %v1318_v31 = vunpack.c.l.b16 %v1277_v24 }
 0x2d3   : > { %v1411_v58 = vmul.f32 %v1296_v8, %v1296_v8 }
 0x2d4   : > { %v1270_v21 = vpop.f32.mrf.mxu2 }
 0x2d5   : > { %v1271_v26 = vadd.f32 %v1911_v49, %v1270_v21  ;;  %v1414_v43 = vsel %vm675_vm9, %v1411_v58, 0.0 }
 0x2d6   : > { %1415 = vadd.xlane.f32.xlu0 %v1414_v43 }
 0x2d7   : > { %v1278_v40 = vpack.c.bf16 %v1271_v26, %v1271_v26 }
 0x2d9   : > { %v1319_v34 = vunpack.c.l.b16 %v1278_v40  ;;  %v1297_v41 = vunpack.c.l.bf16 %v1278_v40 }
 0x2db   : > { %v1321_v48 = vpack.c.b16 %v1319_v34, %v1318_v31  ;;  %v1412_v46 = vmul.f32 %v1297_v41, %v1297_v41 }
 0x2dc   : > { %v1273_v23 = vpop.f32.mrf.mxu2 }
 0x2dd   : > { %v1274_v42 = vadd.f32 %v1911_v49, %v1273_v23  ;;  %1814 = vmatmul.msk.bf16.vlgmr.msrb.gmra.mxu3 %vm675_vm9, %v1321_v48  ;;  %v1417_v44 = vsel %vm675_vm9, %v1412_v46, 0.0 }
 0x2de   : > { %1418 = vadd.xlane.f32.xlu1 %v1417_v44 }
 0x2df   : > { %v1279_v25 = vpack.c.bf16 %v1274_v42, %v1274_v42 }
 0x2e1   : > { %v1298_v32 = vunpack.c.l.bf16 %v1279_v25  ;;  %v1320_v33 = vunpack.c.l.b16 %v1279_v25 }
 0x2e3   : > { %v1413_v52 = vmul.f32 %v1298_v32, %v1298_v32  ;;  %v1322_v37 = vpack.c.b16 %v1320_v33, %v1320_v33 }
 0x2e4   : > { %v1275_v56 = vpop.f32.mrf.mxu2 }
 0x2e5   : > { %v1420_v59 = vsel %vm675_vm9, %v1413_v52, 0.0 }
 0x2e6   : > { %1421 = vadd.xlane.f32.xlu2 %v1420_v59 }
 0x2ec   : > { %v1507_v11 = vpop.f32.mrf.mxu2 }
 0x2ed   : > { %1815 = vmatmul.msk.bf16.gmra.mxu3 %vm675_vm9, %v1322_v37  ;;  %v1510_v22 = vperm.slane %v1507_v11, 0 }
 0x349   : > { %v1416_v60 = vpop.xlane.xlu0 %1415 }
 0x34a   : > { %v1511_v62 = vadd.f32 %v1510_v22, %v1416_v60 }
 0x351   : > { %v1419_v2 = vpop.xlane.xlu1 %1418 }
 0x352   : > { %v1512_v28 = vadd.f32 %v1510_v22, %v1419_v2 }
 0x359   : > { %v1422_v4 = vpop.xlane.xlu2 %1421 }
 0x35a   : > { %v1513_v50 = vadd.f32 %v1510_v22, %v1422_v4 }
 0x360   : > { %v1402_v1 = vpop.f32.mrf.mxu3 }
 0x361   : > { %v1514_v63 = vmul.f32 2.0, %v1402_v1 }
 0x363   : > { %v1517_v0 = vsub.f32 %v1511_v62, %v1514_v63 }
 0x365   : > { %v1520_v36 = vmax.f32 %v1517_v0, 0.0 }
 0x367   : > { %1912 = vrsqrt.f32 %v1520_v36  ;;  %vm1530_vm0 = vcmp.eq.f32.partialorder %v1520_v36, inf  ;;  %v1533_v18 = vand.u32 2147483648, %v1520_v36  ;;  %vm1532_vm1 = vcmp.eq.f32.partialorder %v1520_v36, 0.0 }
 0x368   : > { %v1404_v39 = vpop.f32.mrf.mxu3 }
 0x369   : > { %v1515_v35 = vmul.f32 2.0, %v1404_v39 }
 0x36b   : > { %v1518_v29 = vsub.f32 %v1512_v28, %v1515_v35 }
 0x36d   : > { %v1913_v3 = vpop.eup %1912  ;;  %v1521_v5 = vmax.f32 %v1518_v29, 0.0 }
 0x36e   : > { %v1524_v6 = vmul.f32 %v1913_v3, %v1520_v36 }
 0x36f   : > { %1914 = vrsqrt.f32 %v1521_v5  ;;  %vm1542_vm3 = vcmp.eq.f32.partialorder %v1521_v5, inf  ;;  %v1545_v40 = vand.u32 2147483648, %v1521_v5  ;;  %vm1544_vm4 = vcmp.eq.f32.partialorder %v1521_v5, 0.0 }
 0x370   : > { %v1407_v27 = vpop.f32.mrf.mxu3  ;;  %v1525_v38 = vmul.f32 %v1913_v3, %v1524_v6 }
 0x371   : > { %v1516_v9 = vmul.f32 2.0, %v1407_v27 }
 0x372   : > { %v1526_v12 = vmul.f32 0.5, %v1525_v38 }
 0x373   : > { %v1519_v57 = vsub.f32 %v1513_v50, %v1516_v9 }
 0x374   : > { %v1527_v61 = vsub.f32 1.5, %v1526_v12 }
 0x375   : > { %v1915_v30 = vpop.eup %1914  ;;  %v1522_v13 = vmax.f32 %v1519_v57, 0.0 }
 0x376   : > { %v1528_v45 = vmul.f32 %v1913_v3, %v1527_v61  ;;  %v1536_v16 = vmul.f32 %v1915_v30, %v1521_v5 }
 0x377   : > { %1916 = vrsqrt.f32 %v1522_v13  ;;  %vm1554_vm5 = vcmp.eq.f32.partialorder %v1522_v13, inf  ;;  %v1557_v25 = vand.u32 2147483648, %v1522_v13  ;;  %vm1556_vm6 = vcmp.eq.f32.partialorder %v1522_v13, 0.0 }
 0x378   : > { %v1409_v17 = vpop.f32.mrf.mxu3  ;;  %v1529_v19 = vmul.f32 %v1528_v45, %v1520_v36  ;;  %v1537_v54 = vmul.f32 %v1915_v30, %v1536_v16 }
 0x37a   : > { %v1531_v53 = vsel %vm1530_vm0, %v1520_v36, %v1529_v19  ;;  %v1538_v20 = vmul.f32 0.5, %v1537_v54 }
 0x37b   : > { %v1534_v47 = vsel %vm1532_vm1, %v1533_v18, %v1531_v53 }
 0x37c   : > { %v1559_v10 = vsub.f32 0.0, %v1534_v47  ;;  %v1539_v55 = vsub.f32 1.5, %v1538_v20 }
 0x37d   : > { %v1917_v24 = vpop.eup %1916 }
 0x37e   : > { %v1567_v8 = vsel %vm2568_vm2, -inf, %v1559_v10  ;;  %v1540_v58 = vmul.f32 %v1915_v30, %v1539_v55  ;;  %v1548_v21 = vmul.f32 %v1917_v24, %v1522_v13 }
 0x37f   : > { %1570 = vmax.xlane.f32.xlu2 %v1567_v8 }
 0x380   : > { %v1541_v26 = vmul.f32 %v1540_v58, %v1521_v5  ;;  %v1549_v43 = vmul.f32 %v1917_v24, %v1548_v21 }
 0x382   : > { %v1543_v31 = vsel %vm1542_vm3, %v1521_v5, %v1541_v26  ;;  %v1550_v34 = vmul.f32 0.5, %v1549_v43 }
 0x383   : > { %v1546_v41 = vsel %vm1544_vm4, %v1545_v40, %v1543_v31 }
 0x384   : > { %v1560_v48 = vsub.f32 0.0, %v1546_v41  ;;  %v1551_v46 = vsub.f32 1.5, %v1550_v34 }
 0x386   : > { %v1568_v23 = vsel %vm2568_vm2, -inf, %v1560_v48  ;;  %v1552_v42 = vmul.f32 %v1917_v24, %v1551_v46 }
 0x387   : > { %1572 = vmax.xlane.f32.xlu0 %v1568_v23 }
 0x388   : > { %v1553_v44 = vmul.f32 %v1552_v42, %v1522_v13 }
 0x38a   : > { %v1555_v32 = vsel %vm1554_vm5, %v1522_v13, %v1553_v44 }
 0x38b   : > { %v1558_v52 = vsel %vm1556_vm6, %v1557_v25, %v1555_v32 }
 0x38c   : > { %v1561_v56 = vsub.f32 0.0, %v1558_v52 }
 0x38e   : > { %v1569_v59 = vsel %vm2568_vm2, -inf, %v1561_v56 }
 0x38f   : > { %1574 = vmax.xlane.f32.xlu1 %v1569_v59 }
 0x3f2   : > { %v1571_v33 = vpop.xlane.xlu2 %1570 }
 0x3f3   : > { %v1576_v37 = vsub.f32 %v1567_v8, %v1571_v33 }
 0x3f5   : > { %v1579_v11 = vmul.f32 1.442695, %v1576_v37 }
 0x3f7   : > { %1918 = vpow2.f32 %v1579_v11 }
 0x3fa   : > { %v1573_v22 = vpop.xlane.xlu0 %1572 }
 0x3fb   : > { %v1577_v60 = vsub.f32 %v1568_v23, %v1573_v22 }
 0x3fd   : > { %v1919_v1 = vpop.eup %1918  ;;  %v1581_v62 = vmul.f32 1.442695, %v1577_v60 }
 0x3fe   : > { %1585 = vadd.xlane.f32.xlu2 %v1919_v1 }
 0x3ff   : > { %1920 = vpow2.f32 %v1581_v62 }
 0x402   : > { %v1575_v63 = vpop.xlane.xlu1 %1574 }
 0x403   : > { %v1578_v0 = vsub.f32 %v1569_v59, %v1575_v63 }
 0x405   : > { %v1921_v36 = vpop.eup %1920  ;;  %v1583_v2 = vmul.f32 1.442695, %v1578_v0 }
 0x406   : > { %1587 = vadd.xlane.f32.xlu0 %v1921_v36 }
 0x407   : > { %1922 = vpow2.f32 %v1583_v2 }
 0x40d   : > { %v1923_v39 = vpop.eup %1922 }
 0x40e   : > { %1589 = vadd.xlane.f32.xlu1 %v1923_v39 }
 0x471   : > { %v1586_v28 = vpop.xlane.xlu2 %1585 }
 0x472   : > { %1924 = vlog2.f32 %v1586_v28 }
 0x478   : > { %v1925_v35 = vpop.eup %1924 }
 0x479   : > { %v1592_v29 = vmul.f32 0.6931472, %v1925_v35  ;;  %v1588_v3 = vpop.xlane.xlu0 %1587 }
 0x47a   : > { %1926 = vlog2.f32 %v1588_v3 }
 0x47b   : > { %v1597_v5 = vadd.f32 %v1592_v29, %v1571_v33 }
 0x47d   : > { %v1600_v4 = vsub.f32 %v1567_v8, %v1597_v5 }
 0x47f   : > { %1603 = vst [vmem:[%s459_s16] sm:$0xff] %v1600_v4 }
 0x480   : > { %v1927_v6 = vpop.eup %1926 }
 0x481   : > { %v1594_v14 = vmul.f32 0.6931472, %v1927_v6  ;;  %v1590_v27 = vpop.xlane.xlu1 %1589 }
 0x482   : > { %1928 = vlog2.f32 %v1590_v27 }
 0x483   : > { %v1598_v38 = vadd.f32 %v1594_v14, %v1573_v22 }
 0x485   : > { %v1601_v50 = vsub.f32 %v1568_v23, %v1598_v38 }
 0x487   : > { %1604 = vst [vmem:[%s459_s16 + $0x8] sm:$0xff] %v1601_v50 }
 0x488   : > { %v1929_v9 = vpop.eup %1928 }
 0x489   : > { %v1596_v12 = vmul.f32 0.6931472, %v1929_v9 }
 0x48b   : > { %v1599_v57 = vadd.f32 %v1596_v12, %v1575_v63 }
 0x48d   : > { %v1602_v61 = vsub.f32 %v1569_v59, %v1599_v57 }
 0x48f   : > { %1605 = vst [vmem:[%s459_s16 + $0x10] sm:$0xff] %v1602_v61 }
 0x490   : > { %1957 = shalt.err (!%p1954_p3)
}
 0x491   : > { %s2000_s20 = smov 128   ;;  %s2001_s16 = smov 8  }
 0x492   : > { %1860 = dma.vmem_to_hbm [thread:$0]  (%p2110_p5), %s1620_s30, 384, %s1622_s21, %s1607_s23, %s2000_s20, %s2000_s20, %s2001_s16  }
 0x493 PF: > { %p1866_p4 = scmp.ge.s32.totalorder %s1992_s28, 2  ;;  %s1636_s22 = sand.u32 1, %s1980_s25  }
 0x494   : > { %s1637_s1 = scalar_lea.sflag [#allocation3], %s1636_s22 }
 0x495   : > { %p1863_p7 = pnand %p1866_p4, %p2114_p6 }
 0x497   : > { %p1864_p8 = pneg %p1863_p7 }
 0x499   : > { %1975 = dma.done.wait (%p1864_p8), %s1637_s1, 384  }
 0x49a   : > { %1977 = vsyncadd (%p1864_p8), %s1637_s1, 4294966912  ;;  %s2645_s2 = sld [smem:[#allocation5_spill]]  ;;  %p23_p9 = scmp.ge.s32.totalorder %s2097_s14, 4  }
 0x49b   : > { %s2646_s25 = smov %s1984_s26  ;;  %s2647_s26 = smov %s1988_s27 }
 0x49c   : > { %s2649_s28 = smov %s2097_s14  ;;  %25 = sbr.rel (!%p23_p9) target bundleno = 7 (0x7), region = 113 }
 0x4a0   : > { %s2648_s27 = smov %s2645_s2 }
 0x4a1   :  { %1643 = vsyncpa [#allocation3], 1 }
 0x4a2   :  { %1645 = vsyncpa [#allocation3 + $0x1], 1 }

</bundles_post_ra>
